<compile_context>
chip_gen: v6e
topology: v6e:2x2x1
jax: 0.10.0
libtpu: 0.0.40
codegen_flags: <defaults>
</compile_context>

<pallas_src>
import math
from functools import partial

import numpy as np
import jax
import jax.numpy as jnp
from jax.experimental import pallas as pl
from jax.experimental.pallas import tpu as pltpu

EPS = 1e-6
INV_SQRT2 = 1.0 / math.sqrt(2.0)
LANE = 128

# ------------------------------------------------------------------------------
# Clifford algebra Cl(3,0) tables (numpy, built once at trace time)
# ------------------------------------------------------------------------------
DIM = 3
N_BLADES = 8
N_SUBSPACES = DIM + 1
SUBSPACES = [1, 3, 3, 1]
BLADE_GRADE = np.array([0, 1, 1, 1, 2, 2, 2, 3])          # blade index -> grade
GRADE_SLICES = [(0, 1), (1, 4), (4, 7), (7, 8)]            # blade index range per grade
BLADE_BITS = [0b000, 0b001, 0b010, 0b100, 0b011, 0b101, 0b110, 0b111]
BITS_TO_IDX = {b: i for i, b in enumerate(BLADE_BITS)}


def _reorder_sign(a, b):
    s = 0
    a >>= 1
    while a:
        s += bin(a & b).count("1")
        a >>= 1
    return -1.0 if (s & 1) else 1.0


def _build_cayley(metric=(1.0, 1.0, 1.0)):
    # cayley[i, j, k]: coefficient of blade j in the product e_i * e_k
    cayley = np.zeros((N_BLADES, N_BLADES, N_BLADES), dtype=np.float32)
    for i, ab in enumerate(BLADE_BITS):
        for k, bb in enumerate(BLADE_BITS):
            sign = _reorder_sign(ab, bb)
            common = ab & bb
            for bit in range(DIM):
                if common & (1 << bit):
                    sign *= metric[bit]
            j = BITS_TO_IDX[ab ^ bb]
            cayley[i, j, k] = sign
    return cayley


CAYLEY = _build_cayley()

# result blade of e_i * e_k (exactly one nonzero j per (i,k) pair in Cl(3,0))
RES_J = [[BITS_TO_IDX[BLADE_BITS[i] ^ BLADE_BITS[k]] for k in range(N_BLADES)]
         for i in range(N_BLADES)]


def _geometric_product_paths(cayley):
    paths = np.zeros((N_SUBSPACES, N_SUBSPACES, N_SUBSPACES), dtype=bool)
    for gi in range(N_SUBSPACES):
        for gj in range(N_SUBSPACES):
            for gk in range(N_SUBSPACES):
                (i0, i1), (j0, j1), (k0, k1) = (GRADE_SLICES[gi], GRADE_SLICES[gj],
                                                GRADE_SLICES[gk])
                paths[gi, gj, gk] = np.any(cayley[i0:i1, j0:j1, k0:k1] != 0)
    return paths


PATHS = _geometric_product_paths(CAYLEY)                    # (4,4,4) bool, 20 True
_PATH_IDX = np.argwhere(PATHS)                              # row-major (matches w[:, paths]=...)
N_PATHS = int(_PATH_IDX.shape[0])                           # 20 for Cl(3,0)
N_PATH_PAD = 24                                             # pad rows to a sublane multiple
_PATH_ROW = {tuple(int(v) for v in p): r for r, p in enumerate(_PATH_IDX)}

# GP_GROUPS[k] = [(path_row, [(i, j, sign), ...]), ...]; 44 distinct (k, path) groups
# over the 64 (i, k) pairs; the sign is the Cayley coefficient (+-1 for Cl(3,0)).
GP_GROUPS = []
for _k in range(N_BLADES):
    _groups = {}
    for _i in range(N_BLADES):
        _j = RES_J[_i][_k]
        _key = (int(BLADE_GRADE[_i]), int(BLADE_GRADE[_j]), int(BLADE_GRADE[_k]))
        _sgn = float(CAYLEY[_i, _j, _k])
        assert abs(_sgn) == 1.0
        _groups.setdefault(_PATH_ROW[_key], []).append((_i, _j, _sgn))
    GP_GROUPS.append(sorted(_groups.items()))


# ------------------------------------------------------------------------------
# Pallas kernel (one (feature tile, batch tile) per grid step)
# ------------------------------------------------------------------------------
def _make_kernel(split_x):
    """split_x=True: feature-tiled grid passes x twice (full-F for the matmul K axis and
    the matching feature-tile view for the geometric product / first-order term)."""

    def sgp_kernel(*refs):
        if split_x:
            x_ref, xgp_ref, w_ref, bias_ref, sa_ref, wpath_ref, o_ref = refs
        else:
            x_ref, w_ref, bias_ref, sa_ref, wpath_ref, o_ref = refs
            xgp_ref = x_ref
        # x_ref    : (8, Bt, F_pad)       f32  input multivectors, blade-major (full F)
        # xgp_ref  : (8, Bt, tn)          f32  feature-tile view of x (== x_ref if n_f==1)
        # w_ref    : (4, F_pad, 2*tn)     bf16 fused per-grade [W_right^T | W_left^T] tile
        #                                      (W_left pre-scaled by 1/sqrt(2))
        # bias_ref : (1, tn)              f32  blade-0 bias of linear_left, * 1/sqrt(2)
        # sa_ref   : (4, tn)              f32  sigmoid(a) of the NormalizationLayer
        # wpath_ref: (24, tn)             f32  de-duplicated GP path weights, * 1/sqrt(2)
        # o_ref    : (8, Bt, tn)          f32  output, blade-major
        bt = x_ref.shape[1]
        f_full = x_ref.shape[2]
        tn = o_ref.shape[2]

        xrn = [None] * N_BLADES          # normalized right branch, per blade
        acc = [None] * N_BLADES          # output accumulators, seeded with the left branch

        # ---- fused per-grade [right | left] linear (bf16 MXU, f32 accum) + norm ----
        for g, (lo, hi) in enumerate(GRADE_SLICES):
            ng = hi - lo
            # Stack the blades of this grade on the matmul M axis (3x taller for
            # vector / bivector grades) -> one MXU matmul per grade.
            xg = x_ref[lo:hi].reshape(ng * bt, f_full).astype(jnp.bfloat16)
            rg = jnp.dot(xg, w_ref[g], preferred_element_type=jnp.float32)  # (ng*bt, 2*tn)
            right = rg[:, :tn]
            left = rg[:, tn:]

            # NormalizationLayer on the right branch: the denominator is identical for
            # all blades of a grade -> compute once, invert once (exact reciprocal).
            xr_g = [right[t * bt:(t + 1) * bt, :] for t in range(ng)]
            q = xr_g[0] * xr_g[0]
            for t in range(1, ng):
                q = q + xr_g[t] * xr_g[t]
            norm_g = jnp.sqrt(jnp.sqrt(q * q + 1e-16))          # smooth sqrt(|q|)
            denom = sa_ref[g:g + 1, :] * (norm_g - 1.0) + (1.0 + EPS)
            inv = pl.reciprocal(denom, approx=False)
            for t in range(ng):
                i = lo + t
                xrn[i] = xr_g[t] * inv
                li = left[t * bt:(t + 1) * bt, :]
                if i == 0:                                      # bias lives on blade 0 only
                    li = li + bias_ref[...]
                acc[i] = li                                     # seeds output blade i

        # ---- weighted geometric product, k-major with shared (path * xrn[k]) products.
        # 20 de-duplicated path weights, Cayley sign folded into add/subtract,
        # 44 shared products instead of 64 per-pair weight multiplies.
        # TODO(synk): on v6e/v7x this block could run in packed bf16 (2 elems/lane) for a
        # further VALU cut; kept f32 here pending an accuracy study (v5e has no bf16 VPU).
        wp = wpath_ref[...]                                     # one aligned (24, tn) load
        x_gp = [xgp_ref[i] for i in range(N_BLADES)]            # (bt, tn) per blade
        for k in range(N_BLADES):
            xk = xrn[k]
            for row, members in GP_GROUPS[k]:
                p = wp[row:row + 1, :] * xk                     # shared across pairs
                for (i, j, sgn) in members:
                    if sgn > 0.0:
                        acc[j] = acc[j] + x_gp[i] * p
                    else:
                        acc[j] = acc[j] - x_gp[i] * p

        # 1/sqrt(2) is folded into wl / bias / wpath at wrapper time -> plain store.
        for j in range(N_BLADES):
            o_ref[j, :, :] = acc[j].astype(o_ref.dtype)

    return sgp_kernel


# ------------------------------------------------------------------------------
# Parameter preparation (plain-JAX glue) + wrapper
# ------------------------------------------------------------------------------
def _round_up(v, m):
    return ((v + m - 1) // m) * m


def _resident_spec(shape, index_map):
    """BlockSpec for (quasi-)grid-invariant operands: single buffer to save VMEM."""
    try:
        return pl.BlockSpec(shape, index_map, pipeline_mode=pl.Buffered(1))
    except (AttributeError, TypeError):
        return pl.BlockSpec(shape, index_map)


def _get_geo_weight(w_sparse):
    """Replicates SteerableGeometricProductLayer._get_weight: (F, n_paths) -> (F,8,8,8)."""
    features = w_sparse.shape[0]
    w4 = jnp.zeros((features, N_SUBSPACES, N_SUBSPACES, N_SUBSPACES), w_sparse.dtype)
    w4 = w4.at[:, _PATH_IDX[:, 0], _PATH_IDX[:, 1], _PATH_IDX[:, 2]].set(w_sparse)
    g = BLADE_GRADE
    w8 = w4[:, g][:, :, g][:, :, :, g]                          # repeat_interleave x3
    return jnp.asarray(CAYLEY)[None] * w8                       # (F, 8, 8, 8)


@partial(jax.jit, static_argnames=("b_tile_max", "f_tile_max"))
def steerable_geometric_product(x, w_right, w_left, bias_left, a_norm, w_geo_sparse,
                                *, b_tile_max=None, f_tile_max=None):
    """x: (B, F, 8) float32; returns (B, F, 8). Same math as the PyTorch module."""
    B, F, I = x.shape
    assert I == N_BLADES and w_geo_sparse.shape == (F, N_PATHS)

    F_pad = _round_up(F, LANE)

    # ---- generation-aware VMEM budget (v7x: 64 MiB/TC, 2 TCs; v5e/v6e: 128 MiB/TC) ----
    try:
        vmem_cap = int(pltpu.get_tpu_info().vmem_capacity_bytes)
    except Exception:                                           # conservative fallback
        vmem_cap = 64 << 20
    small_vmem = vmem_cap <= (64 << 20)
    budget = (44 << 20) if small_vmem else (96 << 20)
    cap_limit = (56 << 20) if small_vmem else (110 << 20)

    # ---- output-feature tile tn (resident bf16 fused weights are (4, F_pad, 2*tn)) ----
    tn_cands = sorted({c for c in (F_pad, 2048, 1024, 512, 256, 128)
                       if c <= F_pad and F_pad % c == 0}, reverse=True)
    tn = next((c for c in tn_cands if 16 * F_pad * c <= budget // 2), LANE)
    if f_tile_max is not None:
        allowed = [c for c in tn_cands if c <= max(int(f_tile_max), LANE)]
        tn = min(tn, max(allowed) if allowed else LANE)
    n_f = F_pad // tn

    # ---- batch tile bt (>= 2 grid steps on v7x so both TensorCores get work) ----
    bt_max = 128 if small_vmem else 256
    if small_vmem and F_pad >= 512:
        bt_max = 64
    bt_max = min(bt_max, _round_up(B, 8))
    if small_vmem:
        bt_max = min(bt_max, _round_up((B + 1) // 2, 8))
    if b_tile_max is not None:
        bt_max = min(bt_max, _round_up(int(b_tile_max), 8))
    bt_max = max(bt_max, 8)

    def footprint(bt_):
        return (16 * F_pad * tn                   # resident bf16 fused weights (1 buffer)
                + bt_ * (72 * F_pad + 290 * tn)   # x blocks (x2), out blocks (x2), f32 temps
                + 512 * tn + (2 << 20))           # small operands + Mosaic scratch slack

    bt = bt_max
    while bt > 8 and footprint(bt) > budget:
        bt -= 8
    B_pad = _round_up(B, bt)
    n_b = B_pad // bt
    vmem_limit = int(min(max(footprint(bt) + (12 << 20), 32 << 20), cap_limit))

    # ---- per-grade fused [W_right^T | W_left^T], interleaved per output-feature tile ----
    wr_t = jnp.transpose(w_right, (2, 1, 0))                    # (4, F_in, F_out)
    wl_t = jnp.transpose(w_left, (2, 1, 0)) * INV_SQRT2         # fold the final 1/sqrt(2)
    padw = ((0, 0), (0, F_pad - F), (0, F_pad - F))
    wr_4 = jnp.pad(wr_t, padw).reshape(N_SUBSPACES, F_pad, n_f, tn)
    wl_4 = jnp.pad(wl_t, padw).reshape(N_SUBSPACES, F_pad, n_f, tn)
    w_fused = jnp.concatenate([wr_4, wl_4], axis=-1).reshape(
        N_SUBSPACES, F_pad, n_f * 2 * tn).astype(jnp.bfloat16)

    # ---- blade-0 bias, per-grade sigmoid(a), de-duplicated GP path weights ----
    bias_p = jnp.pad(bias_left[0, :, 0] * INV_SQRT2, (0, F_pad - F)).reshape(1, F_pad)
    sa_p = jnp.pad(jnp.transpose(jax.nn.sigmoid(a_norm), (1, 0)),
                   ((0, 0), (0, F_pad - F)))
    wpath_p = jnp.pad(jnp.transpose(w_geo_sparse, (1, 0)) * INV_SQRT2,
                      ((0, N_PATH_PAD - N_PATHS), (0, F_pad - F)))

    # ---- activations: blade-major, zero padded (pad fused into one jnp.pad) ----
    # TODO(synk): keep activations blade-major (8, B_pad, F_pad) across adjacent CEGNN
    # layers to drop the transpose/pad HBM passes around this kernel entirely.
    x_p = jnp.pad(jnp.transpose(x, (2, 0, 1)),
                  ((0, 0), (0, B_pad - B), (0, F_pad - F)))

    split_x = n_f > 1
    operands = [x_p]
    in_specs = [pl.BlockSpec((N_BLADES, bt, F_pad), lambda fi, bi: (0, bi, 0))]
    if split_x:
        # Feature-tile view of x for the GP / first-order term (avoids dynamic lane
        # slicing in-kernel; only 1/n_f extra HBM read relative to the full-F stream).
        operands.append(x_p)
        in_specs.append(pl.BlockSpec((N_BLADES, bt, tn), lambda fi, bi: (0, bi, fi)))
    operands += [w_fused, bias_p, sa_p, wpath_p]
    in_specs += [
        _resident_spec((N_SUBSPACES, F_pad, 2 * tn), lambda fi, bi: (0, 0, fi)),
        _resident_spec((1, tn), lambda fi, bi: (0, fi)),
        _resident_spec((N_SUBSPACES, tn), lambda fi, bi: (0, fi)),
        _resident_spec((N_PATH_PAD, tn), lambda fi, bi: (0, fi)),
    ]

    out_t = pl.pallas_call(
        _make_kernel(split_x),
        out_shape=jax.ShapeDtypeStruct((N_BLADES, B_pad, F_pad), x.dtype),
        grid_spec=pltpu.PrefetchScalarGridSpec(
            num_scalar_prefetch=0,
            grid=(n_f, n_b),                    # batch innermost -> weights reused
            in_specs=in_specs,
            out_specs=pl.BlockSpec((N_BLADES, bt, tn), lambda fi, bi: (0, bi, fi)),
        ),
        compiler_params=pltpu.CompilerParams(
            dimension_semantics=("parallel", "parallel"),
            vmem_limit_bytes=vmem_limit,
        ),
    )(*operands)

    return jnp.transpose(out_t, (1, 2, 0))[:B, :F, :]           # (B, F, 8)


# ------------------------------------------------------------------------------
# Pure-JAX reference (mirrors the PyTorch code) for a correctness check
# ------------------------------------------------------------------------------
def reference(x, w_right, w_left, bias_left, a_norm, w_geo_sparse):
    B, F, I = x.shape
    g = BLADE_GRADE
    hp = jax.lax.Precision.HIGHEST
    xr = jnp.einsum('bmi,nmi->bni', x, w_right[..., g], precision=hp)
    q = jnp.stack([jnp.sum(xr[..., lo:hi] ** 2, axis=-1) for (lo, hi) in GRADE_SLICES],
                  axis=-1)
    norms = jnp.sqrt(jnp.sqrt(q * q + 1e-16))
    t = jax.nn.sigmoid(a_norm)[None] * (norms - 1.0) + 1.0
    xr = xr / (t[..., g] + EPS)
    w_geo = _get_geo_weight(w_geo_sparse)
    gp = jnp.einsum('bni,nijk,bnk->bnj', x, w_geo, xr, precision=hp)
    xl = jnp.einsum('bmi,nmi->bni', x, w_left[..., g], precision=hp)
    bias = jnp.zeros((1, F, I), x.dtype).at[:, :, 0].set(bias_left[:, :, 0])
    xl = xl + bias
    return (xl + gp) / math.sqrt(2.0)


# ------------------------------------------------------------------------------
if __name__ == "__main__":
    base = jax.random.PRNGKey(0)
    cases = [
        # (B, F, kwargs, tolerance)
        (4, 16, {}, 2e-2),                                       # single, fully padded tile
        (20, 136, dict(b_tile_max=8, f_tile_max=128), 3e-2),     # multi-step batch grid,
                                                                 # 2 feature tiles, padded
                                                                 # batch rows + feature cols
    ]
    for (B, F, kwargs, tol) in cases:
        ks = jax.random.split(jax.random.fold_in(base, 100 * B + F), 6)
        x = jax.random.normal(ks[0], (B, F, N_BLADES), jnp.float32)
        w_right = jax.random.normal(ks[1], (F, F, N_SUBSPACES), jnp.float32) / math.sqrt(F)
        w_left = jax.random.normal(ks[2], (F, F, N_SUBSPACES), jnp.float32) / math.sqrt(F)
        bias_left = 0.5 * jax.random.normal(ks[3], (1, F, 1), jnp.float32)
        a_norm = 0.5 * jax.random.normal(ks[4], (F, N_SUBSPACES), jnp.float32)
        w_geo_sparse = jax.random.normal(ks[5], (F, N_PATHS), jnp.float32) / math.sqrt(DIM + 1)

        out = jax.block_until_ready(steerable_geometric_product(
            x, w_right, w_left, bias_left, a_norm, w_geo_sparse, **kwargs))
        ref = jax.block_until_ready(reference(
            x, w_right, w_left, bias_left, a_norm, w_geo_sparse))

        assert out.shape == (B, F, N_BLADES)
        out_np, ref_np = np.asarray(out), np.asarray(ref)
        # bf16 MXU inputs for the linear layers -> slightly looser tolerance than pure f32.
        if not np.allclose(out_np, ref_np, atol=tol, rtol=tol):
            err = float(np.max(np.abs(out_np - ref_np)))
            raise SystemExit(f"kernel/reference mismatch (B={B}, F={F}, max_err={err:.4g})")
    print("KERNEL_OK")
</pallas_src>

<mosaic_0001>
module attributes {stable_mosaic.version = 11 : i64} {
  func.func @sgp_kernel(%arg0: i32, %arg1: i32, %arg2: memref<8x8x128xf32, #tpu.memory_space<vmem>>, %arg3: memref<4x128x256xbf16, #tpu.memory_space<vmem>>, %arg4: memref<1x128xf32, #tpu.memory_space<vmem>>, %arg5: memref<4x128xf32, #tpu.memory_space<vmem>>, %arg6: memref<24x128xf32, #tpu.memory_space<vmem>>, %arg7: memref<8x8x128xf32, #tpu.memory_space<vmem>>) attributes {dimension_semantics = [#tpu.dimension_semantics<parallel>, #tpu.dimension_semantics<parallel>], iteration_bounds = array<i64: 1, 1>, scalar_prefetch = 0 : i64, scratch_operands = 0 : i64, tpu.core_type = #tpu.core_type<tc>, window_params = [{transform_indices = @transform_0, window_bounds = array<i64: 8, 8, 128>}, {pipeline_mode = #tpu.pipeline_mode<synchronous>, transform_indices = @transform_1, window_bounds = array<i64: 4, 128, 256>}, {pipeline_mode = #tpu.pipeline_mode<synchronous>, transform_indices = @transform_2, window_bounds = array<i64: 1, 128>}, {pipeline_mode = #tpu.pipeline_mode<synchronous>, transform_indices = @transform_3, window_bounds = array<i64: 4, 128>}, {pipeline_mode = #tpu.pipeline_mode<synchronous>, transform_indices = @transform_4, window_bounds = array<i64: 24, 128>}, {transform_indices = @transform_5, window_bounds = array<i64: 8, 8, 128>}]} {
    %c0 = arith.constant 0 : index
    %c0_0 = arith.constant 0 : index
    %c0_1 = arith.constant 0 : index
    %0 = vector.load %arg2[%c0, %c0_0, %c0_1] : memref<8x8x128xf32, #tpu.memory_space<vmem>>, vector<1x8x128xf32>
    %1 = vector.shape_cast %0 : vector<1x8x128xf32> to vector<8x128xf32>
    %2 = arith.truncf %1 : vector<8x128xf32> to vector<8x128xbf16>
    %c0_2 = arith.constant 0 : index
    %c0_3 = arith.constant 0 : index
    %c0_4 = arith.constant 0 : index
    %3 = vector.load %arg3[%c0_2, %c0_3, %c0_4] : memref<4x128x256xbf16, #tpu.memory_space<vmem>>, vector<1x128x256xbf16>
    %4 = vector.shape_cast %3 : vector<1x128x256xbf16> to vector<128x256xbf16>
    %cst = arith.constant dense<0.000000e+00> : vector<8x256xf32>
    %5 = tpu.matmul %2, %4, %cst {dimension_numbers = #tpu.dot_dimension_numbers<[1], [0], [0], [1], [0, 0, 1, 1], [], []>} : vector<8x128xbf16>, vector<128x256xbf16>, vector<8x256xf32> -> vector<8x256xf32>
    %6 = vector.extract_strided_slice %5 {offsets = [0, 0], sizes = [8, 128], strides = [1, 1]} : vector<8x256xf32> to vector<8x128xf32>
    %7 = vector.extract_strided_slice %5 {offsets = [0, 128], sizes = [8, 128], strides = [1, 1]} : vector<8x256xf32> to vector<8x128xf32>
    %8 = arith.mulf %6, %6 : vector<8x128xf32>
    %9 = arith.mulf %8, %8 : vector<8x128xf32>
    %cst_5 = arith.constant 1.000000e-16 : f32
    %10 = vector.broadcast %cst_5 : f32 to vector<8x128xf32>
    %11 = arith.addf %9, %10 : vector<8x128xf32>
    %12 = math.sqrt %11 : vector<8x128xf32>
    %13 = math.sqrt %12 : vector<8x128xf32>
    %c0_6 = arith.constant 0 : index
    %c0_7 = arith.constant 0 : index
    %14 = vector.load %arg5[%c0_6, %c0_7] : memref<4x128xf32, #tpu.memory_space<vmem>>, vector<1x128xf32>
    %cst_8 = arith.constant 1.000000e+00 : f32
    %15 = vector.broadcast %cst_8 : f32 to vector<8x128xf32>
    %16 = arith.subf %13, %15 : vector<8x128xf32>
    %17 = vector.broadcast %14 : vector<1x128xf32> to vector<8x128xf32>
    %18 = arith.mulf %17, %16 : vector<8x128xf32>
    %cst_9 = arith.constant 1.00000095 : f32
    %19 = vector.broadcast %cst_9 : f32 to vector<8x128xf32>
    %20 = arith.addf %18, %19 : vector<8x128xf32>
    %21 = tpu.reciprocal %20 : vector<8x128xf32> -> vector<8x128xf32>
    %22 = arith.mulf %6, %21 : vector<8x128xf32>
    %c0_10 = arith.constant 0 : index
    %c0_11 = arith.constant 0 : index
    %23 = vector.load %arg4[%c0_10, %c0_11] : memref<1x128xf32, #tpu.memory_space<vmem>>, vector<1x128xf32>
    %24 = vector.broadcast %23 : vector<1x128xf32> to vector<8x128xf32>
    %25 = arith.addf %7, %24 : vector<8x128xf32>
    %c1 = arith.constant 1 : index
    %c0_12 = arith.constant 0 : index
    %c0_13 = arith.constant 0 : index
    %26 = vector.load %arg2[%c1, %c0_12, %c0_13] : memref<8x8x128xf32, #tpu.memory_space<vmem>>, vector<3x8x128xf32>
    %27 = vector.shape_cast %26 : vector<3x8x128xf32> to vector<24x128xf32>
    %28 = arith.truncf %27 : vector<24x128xf32> to vector<24x128xbf16>
    %c1_14 = arith.constant 1 : index
    %c0_15 = arith.constant 0 : index
    %c0_16 = arith.constant 0 : index
    %29 = vector.load %arg3[%c1_14, %c0_15, %c0_16] : memref<4x128x256xbf16, #tpu.memory_space<vmem>>, vector<1x128x256xbf16>
    %30 = vector.shape_cast %29 : vector<1x128x256xbf16> to vector<128x256xbf16>
    %cst_17 = arith.constant dense<0.000000e+00> : vector<24x256xf32>
    %31 = tpu.matmul %28, %30, %cst_17 {dimension_numbers = #tpu.dot_dimension_numbers<[1], [0], [0], [1], [0, 0, 1, 1], [], []>} : vector<24x128xbf16>, vector<128x256xbf16>, vector<24x256xf32> -> vector<24x256xf32>
    %32 = vector.extract_strided_slice %31 {offsets = [0, 0], sizes = [24, 128], strides = [1, 1]} : vector<24x256xf32> to vector<24x128xf32>
    %33 = vector.extract_strided_slice %31 {offsets = [0, 128], sizes = [24, 128], strides = [1, 1]} : vector<24x256xf32> to vector<24x128xf32>
    %34 = vector.extract_strided_slice %32 {offsets = [0, 0], sizes = [8, 128], strides = [1, 1]} : vector<24x128xf32> to vector<8x128xf32>
    %35 = vector.extract_strided_slice %32 {offsets = [8, 0], sizes = [8, 128], strides = [1, 1]} : vector<24x128xf32> to vector<8x128xf32>
    %36 = vector.extract_strided_slice %32 {offsets = [16, 0], sizes = [8, 128], strides = [1, 1]} : vector<24x128xf32> to vector<8x128xf32>
    %37 = arith.mulf %34, %34 : vector<8x128xf32>
    %38 = arith.mulf %35, %35 : vector<8x128xf32>
    %39 = arith.addf %37, %38 : vector<8x128xf32>
    %40 = arith.mulf %36, %36 : vector<8x128xf32>
    %41 = arith.addf %39, %40 : vector<8x128xf32>
    %42 = arith.mulf %41, %41 : vector<8x128xf32>
    %cst_18 = arith.constant 1.000000e-16 : f32
    %43 = vector.broadcast %cst_18 : f32 to vector<8x128xf32>
    %44 = arith.addf %42, %43 : vector<8x128xf32>
    %45 = math.sqrt %44 : vector<8x128xf32>
    %46 = math.sqrt %45 : vector<8x128xf32>
    %c1_19 = arith.constant 1 : index
    %c0_20 = arith.constant 0 : index
    %47 = vector.load %arg5[%c1_19, %c0_20] : memref<4x128xf32, #tpu.memory_space<vmem>>, vector<1x128xf32>
    %cst_21 = arith.constant 1.000000e+00 : f32
    %48 = vector.broadcast %cst_21 : f32 to vector<8x128xf32>
    %49 = arith.subf %46, %48 : vector<8x128xf32>
    %50 = vector.broadcast %47 : vector<1x128xf32> to vector<8x128xf32>
    %51 = arith.mulf %50, %49 : vector<8x128xf32>
    %cst_22 = arith.constant 1.00000095 : f32
    %52 = vector.broadcast %cst_22 : f32 to vector<8x128xf32>
    %53 = arith.addf %51, %52 : vector<8x128xf32>
    %54 = tpu.reciprocal %53 : vector<8x128xf32> -> vector<8x128xf32>
    %55 = arith.mulf %34, %54 : vector<8x128xf32>
    %56 = vector.extract_strided_slice %33 {offsets = [0, 0], sizes = [8, 128], strides = [1, 1]} : vector<24x128xf32> to vector<8x128xf32>
    %57 = arith.mulf %35, %54 : vector<8x128xf32>
    %58 = vector.extract_strided_slice %33 {offsets = [8, 0], sizes = [8, 128], strides = [1, 1]} : vector<24x128xf32> to vector<8x128xf32>
    %59 = arith.mulf %36, %54 : vector<8x128xf32>
    %60 = vector.extract_strided_slice %33 {offsets = [16, 0], sizes = [8, 128], strides = [1, 1]} : vector<24x128xf32> to vector<8x128xf32>
    %c4 = arith.constant 4 : index
    %c0_23 = arith.constant 0 : index
    %c0_24 = arith.constant 0 : index
    %61 = vector.load %arg2[%c4, %c0_23, %c0_24] : memref<8x8x128xf32, #tpu.memory_space<vmem>>, vector<3x8x128xf32>
    %62 = vector.shape_cast %61 : vector<3x8x128xf32> to vector<24x128xf32>
    %63 = arith.truncf %62 : vector<24x128xf32> to vector<24x128xbf16>
    %c2 = arith.constant 2 : index
    %c0_25 = arith.constant 0 : index
    %c0_26 = arith.constant 0 : index
    %64 = vector.load %arg3[%c2, %c0_25, %c0_26] : memref<4x128x256xbf16, #tpu.memory_space<vmem>>, vector<1x128x256xbf16>
    %65 = vector.shape_cast %64 : vector<1x128x256xbf16> to vector<128x256xbf16>
    %cst_27 = arith.constant dense<0.000000e+00> : vector<24x256xf32>
    %66 = tpu.matmul %63, %65, %cst_27 {dimension_numbers = #tpu.dot_dimension_numbers<[1], [0], [0], [1], [0, 0, 1, 1], [], []>} : vector<24x128xbf16>, vector<128x256xbf16>, vector<24x256xf32> -> vector<24x256xf32>
    %67 = vector.extract_strided_slice %66 {offsets = [0, 0], sizes = [24, 128], strides = [1, 1]} : vector<24x256xf32> to vector<24x128xf32>
    %68 = vector.extract_strided_slice %66 {offsets = [0, 128], sizes = [24, 128], strides = [1, 1]} : vector<24x256xf32> to vector<24x128xf32>
    %69 = vector.extract_strided_slice %67 {offsets = [0, 0], sizes = [8, 128], strides = [1, 1]} : vector<24x128xf32> to vector<8x128xf32>
    %70 = vector.extract_strided_slice %67 {offsets = [8, 0], sizes = [8, 128], strides = [1, 1]} : vector<24x128xf32> to vector<8x128xf32>
    %71 = vector.extract_strided_slice %67 {offsets = [16, 0], sizes = [8, 128], strides = [1, 1]} : vector<24x128xf32> to vector<8x128xf32>
    %72 = arith.mulf %69, %69 : vector<8x128xf32>
    %73 = arith.mulf %70, %70 : vector<8x128xf32>
    %74 = arith.addf %72, %73 : vector<8x128xf32>
    %75 = arith.mulf %71, %71 : vector<8x128xf32>
    %76 = arith.addf %74, %75 : vector<8x128xf32>
    %77 = arith.mulf %76, %76 : vector<8x128xf32>
    %cst_28 = arith.constant 1.000000e-16 : f32
    %78 = vector.broadcast %cst_28 : f32 to vector<8x128xf32>
    %79 = arith.addf %77, %78 : vector<8x128xf32>
    %80 = math.sqrt %79 : vector<8x128xf32>
    %81 = math.sqrt %80 : vector<8x128xf32>
    %c2_29 = arith.constant 2 : index
    %c0_30 = arith.constant 0 : index
    %82 = vector.load %arg5[%c2_29, %c0_30] : memref<4x128xf32, #tpu.memory_space<vmem>>, vector<1x128xf32>
    %cst_31 = arith.constant 1.000000e+00 : f32
    %83 = vector.broadcast %cst_31 : f32 to vector<8x128xf32>
    %84 = arith.subf %81, %83 : vector<8x128xf32>
    %85 = vector.broadcast %82 : vector<1x128xf32> to vector<8x128xf32>
    %86 = arith.mulf %85, %84 : vector<8x128xf32>
    %cst_32 = arith.constant 1.00000095 : f32
    %87 = vector.broadcast %cst_32 : f32 to vector<8x128xf32>
    %88 = arith.addf %86, %87 : vector<8x128xf32>
    %89 = tpu.reciprocal %88 : vector<8x128xf32> -> vector<8x128xf32>
    %90 = arith.mulf %69, %89 : vector<8x128xf32>
    %91 = vector.extract_strided_slice %68 {offsets = [0, 0], sizes = [8, 128], strides = [1, 1]} : vector<24x128xf32> to vector<8x128xf32>
    %92 = arith.mulf %70, %89 : vector<8x128xf32>
    %93 = vector.extract_strided_slice %68 {offsets = [8, 0], sizes = [8, 128], strides = [1, 1]} : vector<24x128xf32> to vector<8x128xf32>
    %94 = arith.mulf %71, %89 : vector<8x128xf32>
    %95 = vector.extract_strided_slice %68 {offsets = [16, 0], sizes = [8, 128], strides = [1, 1]} : vector<24x128xf32> to vector<8x128xf32>
    %c7 = arith.constant 7 : index
    %c0_33 = arith.constant 0 : index
    %c0_34 = arith.constant 0 : index
    %96 = vector.load %arg2[%c7, %c0_33, %c0_34] : memref<8x8x128xf32, #tpu.memory_space<vmem>>, vector<1x8x128xf32>
    %97 = vector.shape_cast %96 : vector<1x8x128xf32> to vector<8x128xf32>
    %98 = arith.truncf %97 : vector<8x128xf32> to vector<8x128xbf16>
    %c3 = arith.constant 3 : index
    %c0_35 = arith.constant 0 : index
    %c0_36 = arith.constant 0 : index
    %99 = vector.load %arg3[%c3, %c0_35, %c0_36] : memref<4x128x256xbf16, #tpu.memory_space<vmem>>, vector<1x128x256xbf16>
    %100 = vector.shape_cast %99 : vector<1x128x256xbf16> to vector<128x256xbf16>
    %cst_37 = arith.constant dense<0.000000e+00> : vector<8x256xf32>
    %101 = tpu.matmul %98, %100, %cst_37 {dimension_numbers = #tpu.dot_dimension_numbers<[1], [0], [0], [1], [0, 0, 1, 1], [], []>} : vector<8x128xbf16>, vector<128x256xbf16>, vector<8x256xf32> -> vector<8x256xf32>
    %102 = vector.extract_strided_slice %101 {offsets = [0, 0], sizes = [8, 128], strides = [1, 1]} : vector<8x256xf32> to vector<8x128xf32>
    %103 = vector.extract_strided_slice %101 {offsets = [0, 128], sizes = [8, 128], strides = [1, 1]} : vector<8x256xf32> to vector<8x128xf32>
    %104 = arith.mulf %102, %102 : vector<8x128xf32>
    %105 = arith.mulf %104, %104 : vector<8x128xf32>
    %cst_38 = arith.constant 1.000000e-16 : f32
    %106 = vector.broadcast %cst_38 : f32 to vector<8x128xf32>
    %107 = arith.addf %105, %106 : vector<8x128xf32>
    %108 = math.sqrt %107 : vector<8x128xf32>
    %109 = math.sqrt %108 : vector<8x128xf32>
    %c3_39 = arith.constant 3 : index
    %c0_40 = arith.constant 0 : index
    %110 = vector.load %arg5[%c3_39, %c0_40] : memref<4x128xf32, #tpu.memory_space<vmem>>, vector<1x128xf32>
    %cst_41 = arith.constant 1.000000e+00 : f32
    %111 = vector.broadcast %cst_41 : f32 to vector<8x128xf32>
    %112 = arith.subf %109, %111 : vector<8x128xf32>
    %113 = vector.broadcast %110 : vector<1x128xf32> to vector<8x128xf32>
    %114 = arith.mulf %113, %112 : vector<8x128xf32>
    %cst_42 = arith.constant 1.00000095 : f32
    %115 = vector.broadcast %cst_42 : f32 to vector<8x128xf32>
    %116 = arith.addf %114, %115 : vector<8x128xf32>
    %117 = tpu.reciprocal %116 : vector<8x128xf32> -> vector<8x128xf32>
    %118 = arith.mulf %102, %117 : vector<8x128xf32>
    %c0_43 = arith.constant 0 : index
    %c0_44 = arith.constant 0 : index
    %119 = vector.load %arg6[%c0_43, %c0_44] : memref<24x128xf32, #tpu.memory_space<vmem>>, vector<24x128xf32>
    %c0_45 = arith.constant 0 : index
    %c0_46 = arith.constant 0 : index
    %c0_47 = arith.constant 0 : index
    %120 = vector.load %arg2[%c0_45, %c0_46, %c0_47] : memref<8x8x128xf32, #tpu.memory_space<vmem>>, vector<1x8x128xf32>
    %121 = vector.shape_cast %120 : vector<1x8x128xf32> to vector<8x128xf32>
    %c1_48 = arith.constant 1 : index
    %c0_49 = arith.constant 0 : index
    %c0_50 = arith.constant 0 : index
    %122 = vector.load %arg2[%c1_48, %c0_49, %c0_50] : memref<8x8x128xf32, #tpu.memory_space<vmem>>, vector<1x8x128xf32>
    %123 = vector.shape_cast %122 : vector<1x8x128xf32> to vector<8x128xf32>
    %c2_51 = arith.constant 2 : index
    %c0_52 = arith.constant 0 : index
    %c0_53 = arith.constant 0 : index
    %124 = vector.load %arg2[%c2_51, %c0_52, %c0_53] : memref<8x8x128xf32, #tpu.memory_space<vmem>>, vector<1x8x128xf32>
    %125 = vector.shape_cast %124 : vector<1x8x128xf32> to vector<8x128xf32>
    %c3_54 = arith.constant 3 : index
    %c0_55 = arith.constant 0 : index
    %c0_56 = arith.constant 0 : index
    %126 = vector.load %arg2[%c3_54, %c0_55, %c0_56] : memref<8x8x128xf32, #tpu.memory_space<vmem>>, vector<1x8x128xf32>
    %127 = vector.shape_cast %126 : vector<1x8x128xf32> to vector<8x128xf32>
    %c4_57 = arith.constant 4 : index
    %c0_58 = arith.constant 0 : index
    %c0_59 = arith.constant 0 : index
    %128 = vector.load %arg2[%c4_57, %c0_58, %c0_59] : memref<8x8x128xf32, #tpu.memory_space<vmem>>, vector<1x8x128xf32>
    %129 = vector.shape_cast %128 : vector<1x8x128xf32> to vector<8x128xf32>
    %c5 = arith.constant 5 : index
    %c0_60 = arith.constant 0 : index
    %c0_61 = arith.constant 0 : index
    %130 = vector.load %arg2[%c5, %c0_60, %c0_61] : memref<8x8x128xf32, #tpu.memory_space<vmem>>, vector<1x8x128xf32>
    %131 = vector.shape_cast %130 : vector<1x8x128xf32> to vector<8x128xf32>
    %c6 = arith.constant 6 : index
    %c0_62 = arith.constant 0 : index
    %c0_63 = arith.constant 0 : index
    %132 = vector.load %arg2[%c6, %c0_62, %c0_63] : memref<8x8x128xf32, #tpu.memory_space<vmem>>, vector<1x8x128xf32>
    %133 = vector.shape_cast %132 : vector<1x8x128xf32> to vector<8x128xf32>
    %c7_64 = arith.constant 7 : index
    %c0_65 = arith.constant 0 : index
    %c0_66 = arith.constant 0 : index
    %134 = vector.load %arg2[%c7_64, %c0_65, %c0_66] : memref<8x8x128xf32, #tpu.memory_space<vmem>>, vector<1x8x128xf32>
    %135 = vector.shape_cast %134 : vector<1x8x128xf32> to vector<8x128xf32>
    %136 = vector.extract_strided_slice %119 {offsets = [0, 0], sizes = [1, 128], strides = [1, 1]} : vector<24x128xf32> to vector<1x128xf32>
    %137 = vector.broadcast %136 : vector<1x128xf32> to vector<8x128xf32>
    %138 = arith.mulf %137, %22 : vector<8x128xf32>
    %139 = arith.mulf %121, %138 : vector<8x128xf32>
    %140 = arith.addf %25, %139 : vector<8x128xf32>
    %141 = vector.extract_strided_slice %119 {offsets = [5, 0], sizes = [1, 128], strides = [1, 1]} : vector<24x128xf32> to vector<1x128xf32>
    %142 = vector.broadcast %141 : vector<1x128xf32> to vector<8x128xf32>
    %143 = arith.mulf %142, %22 : vector<8x128xf32>
    %144 = arith.mulf %123, %143 : vector<8x128xf32>
    %145 = arith.addf %56, %144 : vector<8x128xf32>
    %146 = arith.mulf %125, %143 : vector<8x128xf32>
    %147 = arith.addf %58, %146 : vector<8x128xf32>
    %148 = arith.mulf %127, %143 : vector<8x128xf32>
    %149 = arith.addf %60, %148 : vector<8x128xf32>
    %150 = vector.extract_strided_slice %119 {offsets = [13, 0], sizes = [1, 128], strides = [1, 1]} : vector<24x128xf32> to vector<1x128xf32>
    %151 = vector.broadcast %150 : vector<1x128xf32> to vector<8x128xf32>
    %152 = arith.mulf %151, %22 : vector<8x128xf32>
    %153 = arith.mulf %129, %152 : vector<8x128xf32>
    %154 = arith.addf %91, %153 : vector<8x128xf32>
    %155 = arith.mulf %131, %152 : vector<8x128xf32>
    %156 = arith.addf %93, %155 : vector<8x128xf32>
    %157 = arith.mulf %133, %152 : vector<8x128xf32>
    %158 = arith.addf %95, %157 : vector<8x128xf32>
    %159 = vector.extract_strided_slice %119 {offsets = [19, 0], sizes = [1, 128], strides = [1, 1]} : vector<24x128xf32> to vector<1x128xf32>
    %160 = vector.broadcast %159 : vector<1x128xf32> to vector<8x128xf32>
    %161 = arith.mulf %160, %22 : vector<8x128xf32>
    %162 = arith.mulf %135, %161 : vector<8x128xf32>
    %163 = arith.addf %103, %162 : vector<8x128xf32>
    %164 = vector.extract_strided_slice %119 {offsets = [1, 0], sizes = [1, 128], strides = [1, 1]} : vector<24x128xf32> to vector<1x128xf32>
    %165 = vector.broadcast %164 : vector<1x128xf32> to vector<8x128xf32>
    %166 = arith.mulf %165, %55 : vector<8x128xf32>
    %167 = arith.mulf %121, %166 : vector<8x128xf32>
    %168 = arith.addf %145, %167 : vector<8x128xf32>
    %169 = vector.extract_strided_slice %119 {offsets = [4, 0], sizes = [1, 128], strides = [1, 1]} : vector<24x128xf32> to vector<1x128xf32>
    %170 = vector.broadcast %169 : vector<1x128xf32> to vector<8x128xf32>
    %171 = arith.mulf %170, %55 : vector<8x128xf32>
    %172 = arith.mulf %123, %171 : vector<8x128xf32>
    %173 = arith.addf %140, %172 : vector<8x128xf32>
    %174 = vector.extract_strided_slice %119 {offsets = [7, 0], sizes = [1, 128], strides = [1, 1]} : vector<24x128xf32> to vector<1x128xf32>
    %175 = vector.broadcast %174 : vector<1x128xf32> to vector<8x128xf32>
    %176 = arith.mulf %175, %55 : vector<8x128xf32>
    %177 = arith.mulf %125, %176 : vector<8x128xf32>
    %178 = arith.subf %154, %177 : vector<8x128xf32>
    %179 = arith.mulf %127, %176 : vector<8x128xf32>
    %180 = arith.subf %156, %179 : vector<8x128xf32>
    %181 = vector.extract_strided_slice %119 {offsets = [11, 0], sizes = [1, 128], strides = [1, 1]} : vector<24x128xf32> to vector<1x128xf32>
    %182 = vector.broadcast %181 : vector<1x128xf32> to vector<8x128xf32>
    %183 = arith.mulf %182, %55 : vector<8x128xf32>
    %184 = arith.mulf %129, %183 : vector<8x128xf32>
    %185 = arith.subf %147, %184 : vector<8x128xf32>
    %186 = arith.mulf %131, %183 : vector<8x128xf32>
    %187 = arith.subf %149, %186 : vector<8x128xf32>
    %188 = vector.extract_strided_slice %119 {offsets = [15, 0], sizes = [1, 128], strides = [1, 1]} : vector<24x128xf32> to vector<1x128xf32>
    %189 = vector.broadcast %188 : vector<1x128xf32> to vector<8x128xf32>
    %190 = arith.mulf %189, %55 : vector<8x128xf32>
    %191 = arith.mulf %133, %190 : vector<8x128xf32>
    %192 = arith.addf %163, %191 : vector<8x128xf32>
    %193 = vector.extract_strided_slice %119 {offsets = [18, 0], sizes = [1, 128], strides = [1, 1]} : vector<24x128xf32> to vector<1x128xf32>
    %194 = vector.broadcast %193 : vector<1x128xf32> to vector<8x128xf32>
    %195 = arith.mulf %194, %55 : vector<8x128xf32>
    %196 = arith.mulf %135, %195 : vector<8x128xf32>
    %197 = arith.addf %158, %196 : vector<8x128xf32>
    %198 = vector.extract_strided_slice %119 {offsets = [1, 0], sizes = [1, 128], strides = [1, 1]} : vector<24x128xf32> to vector<1x128xf32>
    %199 = vector.broadcast %198 : vector<1x128xf32> to vector<8x128xf32>
    %200 = arith.mulf %199, %57 : vector<8x128xf32>
    %201 = arith.mulf %121, %200 : vector<8x128xf32>
    %202 = arith.addf %185, %201 : vector<8x128xf32>
    %203 = vector.extract_strided_slice %119 {offsets = [4, 0], sizes = [1, 128], strides = [1, 1]} : vector<24x128xf32> to vector<1x128xf32>
    %204 = vector.broadcast %203 : vector<1x128xf32> to vector<8x128xf32>
    %205 = arith.mulf %204, %57 : vector<8x128xf32>
    %206 = arith.mulf %125, %205 : vector<8x128xf32>
    %207 = arith.addf %173, %206 : vector<8x128xf32>
    %208 = vector.extract_strided_slice %119 {offsets = [7, 0], sizes = [1, 128], strides = [1, 1]} : vector<24x128xf32> to vector<1x128xf32>
    %209 = vector.broadcast %208 : vector<1x128xf32> to vector<8x128xf32>
    %210 = arith.mulf %209, %57 : vector<8x128xf32>
    %211 = arith.mulf %123, %210 : vector<8x128xf32>
    %212 = arith.addf %178, %211 : vector<8x128xf32>
    %213 = arith.mulf %127, %210 : vector<8x128xf32>
    %214 = arith.subf %197, %213 : vector<8x128xf32>
    %215 = vector.extract_strided_slice %119 {offsets = [11, 0], sizes = [1, 128], strides = [1, 1]} : vector<24x128xf32> to vector<1x128xf32>
    %216 = vector.broadcast %215 : vector<1x128xf32> to vector<8x128xf32>
    %217 = arith.mulf %216, %57 : vector<8x128xf32>
    %218 = arith.mulf %129, %217 : vector<8x128xf32>
    %219 = arith.addf %168, %218 : vector<8x128xf32>
    %220 = arith.mulf %133, %217 : vector<8x128xf32>
    %221 = arith.subf %187, %220 : vector<8x128xf32>
    %222 = vector.extract_strided_slice %119 {offsets = [15, 0], sizes = [1, 128], strides = [1, 1]} : vector<24x128xf32> to vector<1x128xf32>
    %223 = vector.broadcast %222 : vector<1x128xf32> to vector<8x128xf32>
    %224 = arith.mulf %223, %57 : vector<8x128xf32>
    %225 = arith.mulf %131, %224 : vector<8x128xf32>
    %226 = arith.subf %192, %225 : vector<8x128xf32>
    %227 = vector.extract_strided_slice %119 {offsets = [18, 0], sizes = [1, 128], strides = [1, 1]} : vector<24x128xf32> to vector<1x128xf32>
    %228 = vector.broadcast %227 : vector<1x128xf32> to vector<8x128xf32>
    %229 = arith.mulf %228, %57 : vector<8x128xf32>
    %230 = arith.mulf %135, %229 : vector<8x128xf32>
    %231 = arith.subf %180, %230 : vector<8x128xf32>
    %232 = vector.extract_strided_slice %119 {offsets = [1, 0], sizes = [1, 128], strides = [1, 1]} : vector<24x128xf32> to vector<1x128xf32>
    %233 = vector.broadcast %232 : vector<1x128xf32> to vector<8x128xf32>
    %234 = arith.mulf %233, %59 : vector<8x128xf32>
    %235 = arith.mulf %121, %234 : vector<8x128xf32>
    %236 = arith.addf %221, %235 : vector<8x128xf32>
    %237 = vector.extract_strided_slice %119 {offsets = [4, 0], sizes = [1, 128], strides = [1, 1]} : vector<24x128xf32> to vector<1x128xf32>
    %238 = vector.broadcast %237 : vector<1x128xf32> to vector<8x128xf32>
    %239 = arith.mulf %238, %59 : vector<8x128xf32>
    %240 = arith.mulf %127, %239 : vector<8x128xf32>
    %241 = arith.addf %207, %240 : vector<8x128xf32>
    %242 = vector.extract_strided_slice %119 {offsets = [7, 0], sizes = [1, 128], strides = [1, 1]} : vector<24x128xf32> to vector<1x128xf32>
    %243 = vector.broadcast %242 : vector<1x128xf32> to vector<8x128xf32>
    %244 = arith.mulf %243, %59 : vector<8x128xf32>
    %245 = arith.mulf %123, %244 : vector<8x128xf32>
    %246 = arith.addf %231, %245 : vector<8x128xf32>
    %247 = arith.mulf %125, %244 : vector<8x128xf32>
    %248 = arith.addf %214, %247 : vector<8x128xf32>
    %249 = vector.extract_strided_slice %119 {offsets = [11, 0], sizes = [1, 128], strides = [1, 1]} : vector<24x128xf32> to vector<1x128xf32>
    %250 = vector.broadcast %249 : vector<1x128xf32> to vector<8x128xf32>
    %251 = arith.mulf %250, %59 : vector<8x128xf32>
    %252 = arith.mulf %131, %251 : vector<8x128xf32>
    %253 = arith.addf %219, %252 : vector<8x128xf32>
    %254 = arith.mulf %133, %251 : vector<8x128xf32>
    %255 = arith.addf %202, %254 : vector<8x128xf32>
    %256 = vector.extract_strided_slice %119 {offsets = [15, 0], sizes = [1, 128], strides = [1, 1]} : vector<24x128xf32> to vector<1x128xf32>
    %257 = vector.broadcast %256 : vector<1x128xf32> to vector<8x128xf32>
    %258 = arith.mulf %257, %59 : vector<8x128xf32>
    %259 = arith.mulf %129, %258 : vector<8x128xf32>
    %260 = arith.addf %226, %259 : vector<8x128xf32>
    %261 = vector.extract_strided_slice %119 {offsets = [18, 0], sizes = [1, 128], strides = [1, 1]} : vector<24x128xf32> to vector<1x128xf32>
    %262 = vector.broadcast %261 : vector<1x128xf32> to vector<8x128xf32>
    %263 = arith.mulf %262, %59 : vector<8x128xf32>
    %264 = arith.mulf %135, %263 : vector<8x128xf32>
    %265 = arith.addf %212, %264 : vector<8x128xf32>
    %266 = vector.extract_strided_slice %119 {offsets = [2, 0], sizes = [1, 128], strides = [1, 1]} : vector<24x128xf32> to vector<1x128xf32>
    %267 = vector.broadcast %266 : vector<1x128xf32> to vector<8x128xf32>
    %268 = arith.mulf %267, %90 : vector<8x128xf32>
    %269 = arith.mulf %121, %268 : vector<8x128xf32>
    %270 = arith.addf %265, %269 : vector<8x128xf32>
    %271 = vector.extract_strided_slice %119 {offsets = [6, 0], sizes = [1, 128], strides = [1, 1]} : vector<24x128xf32> to vector<1x128xf32>
    %272 = vector.broadcast %271 : vector<1x128xf32> to vector<8x128xf32>
    %273 = arith.mulf %272, %90 : vector<8x128xf32>
    %274 = arith.mulf %123, %273 : vector<8x128xf32>
    %275 = arith.addf %255, %274 : vector<8x128xf32>
    %276 = arith.mulf %125, %273 : vector<8x128xf32>
    %277 = arith.subf %253, %276 : vector<8x128xf32>
    %278 = vector.extract_strided_slice %119 {offsets = [9, 0], sizes = [1, 128], strides = [1, 1]} : vector<24x128xf32> to vector<1x128xf32>
    %279 = vector.broadcast %278 : vector<1x128xf32> to vector<8x128xf32>
    %280 = arith.mulf %279, %90 : vector<8x128xf32>
    %281 = arith.mulf %127, %280 : vector<8x128xf32>
    %282 = arith.addf %260, %281 : vector<8x128xf32>
    %283 = vector.extract_strided_slice %119 {offsets = [10, 0], sizes = [1, 128], strides = [1, 1]} : vector<24x128xf32> to vector<1x128xf32>
    %284 = vector.broadcast %283 : vector<1x128xf32> to vector<8x128xf32>
    %285 = arith.mulf %284, %90 : vector<8x128xf32>
    %286 = arith.mulf %129, %285 : vector<8x128xf32>
    %287 = arith.subf %241, %286 : vector<8x128xf32>
    %288 = vector.extract_strided_slice %119 {offsets = [14, 0], sizes = [1, 128], strides = [1, 1]} : vector<24x128xf32> to vector<1x128xf32>
    %289 = vector.broadcast %288 : vector<1x128xf32> to vector<8x128xf32>
    %290 = arith.mulf %289, %90 : vector<8x128xf32>
    %291 = arith.mulf %131, %290 : vector<8x128xf32>
    %292 = arith.addf %248, %291 : vector<8x128xf32>
    %293 = arith.mulf %133, %290 : vector<8x128xf32>
    %294 = arith.subf %246, %293 : vector<8x128xf32>
    %295 = vector.extract_strided_slice %119 {offsets = [17, 0], sizes = [1, 128], strides = [1, 1]} : vector<24x128xf32> to vector<1x128xf32>
    %296 = vector.broadcast %295 : vector<1x128xf32> to vector<8x128xf32>
    %297 = arith.mulf %296, %90 : vector<8x128xf32>
    %298 = arith.mulf %135, %297 : vector<8x128xf32>
    %299 = arith.subf %236, %298 : vector<8x128xf32>
    %300 = vector.extract_strided_slice %119 {offsets = [2, 0], sizes = [1, 128], strides = [1, 1]} : vector<24x128xf32> to vector<1x128xf32>
    %301 = vector.broadcast %300 : vector<1x128xf32> to vector<8x128xf32>
    %302 = arith.mulf %301, %92 : vector<8x128xf32>
    %303 = arith.mulf %121, %302 : vector<8x128xf32>
    %304 = arith.addf %294, %303 : vector<8x128xf32>
    %305 = vector.extract_strided_slice %119 {offsets = [6, 0], sizes = [1, 128], strides = [1, 1]} : vector<24x128xf32> to vector<1x128xf32>
    %306 = vector.broadcast %305 : vector<1x128xf32> to vector<8x128xf32>
    %307 = arith.mulf %306, %92 : vector<8x128xf32>
    %308 = arith.mulf %123, %307 : vector<8x128xf32>
    %309 = arith.addf %299, %308 : vector<8x128xf32>
    %310 = arith.mulf %127, %307 : vector<8x128xf32>
    %311 = arith.subf %277, %310 : vector<8x128xf32>
    %312 = vector.extract_strided_slice %119 {offsets = [9, 0], sizes = [1, 128], strides = [1, 1]} : vector<24x128xf32> to vector<1x128xf32>
    %313 = vector.broadcast %312 : vector<1x128xf32> to vector<8x128xf32>
    %314 = arith.mulf %313, %92 : vector<8x128xf32>
    %315 = arith.mulf %125, %314 : vector<8x128xf32>
    %316 = arith.subf %282, %315 : vector<8x128xf32>
    %317 = vector.extract_strided_slice %119 {offsets = [10, 0], sizes = [1, 128], strides = [1, 1]} : vector<24x128xf32> to vector<1x128xf32>
    %318 = vector.broadcast %317 : vector<1x128xf32> to vector<8x128xf32>
    %319 = arith.mulf %318, %92 : vector<8x128xf32>
    %320 = arith.mulf %131, %319 : vector<8x128xf32>
    %321 = arith.subf %287, %320 : vector<8x128xf32>
    %322 = vector.extract_strided_slice %119 {offsets = [14, 0], sizes = [1, 128], strides = [1, 1]} : vector<24x128xf32> to vector<1x128xf32>
    %323 = vector.broadcast %322 : vector<1x128xf32> to vector<8x128xf32>
    %324 = arith.mulf %323, %92 : vector<8x128xf32>
    %325 = arith.mulf %129, %324 : vector<8x128xf32>
    %326 = arith.subf %292, %325 : vector<8x128xf32>
    %327 = arith.mulf %133, %324 : vector<8x128xf32>
    %328 = arith.addf %270, %327 : vector<8x128xf32>
    %329 = vector.extract_strided_slice %119 {offsets = [17, 0], sizes = [1, 128], strides = [1, 1]} : vector<24x128xf32> to vector<1x128xf32>
    %330 = vector.broadcast %329 : vector<1x128xf32> to vector<8x128xf32>
    %331 = arith.mulf %330, %92 : vector<8x128xf32>
    %332 = arith.mulf %135, %331 : vector<8x128xf32>
    %333 = arith.addf %275, %332 : vector<8x128xf32>
    %334 = vector.extract_strided_slice %119 {offsets = [2, 0], sizes = [1, 128], strides = [1, 1]} : vector<24x128xf32> to vector<1x128xf32>
    %335 = vector.broadcast %334 : vector<1x128xf32> to vector<8x128xf32>
    %336 = arith.mulf %335, %94 : vector<8x128xf32>
    %337 = arith.mulf %121, %336 : vector<8x128xf32>
    %338 = arith.addf %326, %337 : vector<8x128xf32>
    %339 = vector.extract_strided_slice %119 {offsets = [6, 0], sizes = [1, 128], strides = [1, 1]} : vector<24x128xf32> to vector<1x128xf32>
    %340 = vector.broadcast %339 : vector<1x128xf32> to vector<8x128xf32>
    %341 = arith.mulf %340, %94 : vector<8x128xf32>
    %342 = arith.mulf %125, %341 : vector<8x128xf32>
    %343 = arith.addf %309, %342 : vector<8x128xf32>
    %344 = arith.mulf %127, %341 : vector<8x128xf32>
    %345 = arith.subf %333, %344 : vector<8x128xf32>
    %346 = vector.extract_strided_slice %119 {offsets = [9, 0], sizes = [1, 128], strides = [1, 1]} : vector<24x128xf32> to vector<1x128xf32>
    %347 = vector.broadcast %346 : vector<1x128xf32> to vector<8x128xf32>
    %348 = arith.mulf %347, %94 : vector<8x128xf32>
    %349 = arith.mulf %123, %348 : vector<8x128xf32>
    %350 = arith.addf %316, %349 : vector<8x128xf32>
    %351 = vector.extract_strided_slice %119 {offsets = [10, 0], sizes = [1, 128], strides = [1, 1]} : vector<24x128xf32> to vector<1x128xf32>
    %352 = vector.broadcast %351 : vector<1x128xf32> to vector<8x128xf32>
    %353 = arith.mulf %352, %94 : vector<8x128xf32>
    %354 = arith.mulf %133, %353 : vector<8x128xf32>
    %355 = arith.subf %321, %354 : vector<8x128xf32>
    %356 = vector.extract_strided_slice %119 {offsets = [14, 0], sizes = [1, 128], strides = [1, 1]} : vector<24x128xf32> to vector<1x128xf32>
    %357 = vector.broadcast %356 : vector<1x128xf32> to vector<8x128xf32>
    %358 = arith.mulf %357, %94 : vector<8x128xf32>
    %359 = arith.mulf %129, %358 : vector<8x128xf32>
    %360 = arith.addf %304, %359 : vector<8x128xf32>
    %361 = arith.mulf %131, %358 : vector<8x128xf32>
    %362 = arith.subf %328, %361 : vector<8x128xf32>
    %363 = vector.extract_strided_slice %119 {offsets = [17, 0], sizes = [1, 128], strides = [1, 1]} : vector<24x128xf32> to vector<1x128xf32>
    %364 = vector.broadcast %363 : vector<1x128xf32> to vector<8x128xf32>
    %365 = arith.mulf %364, %94 : vector<8x128xf32>
    %366 = arith.mulf %135, %365 : vector<8x128xf32>
    %367 = arith.subf %311, %366 : vector<8x128xf32>
    %368 = vector.extract_strided_slice %119 {offsets = [3, 0], sizes = [1, 128], strides = [1, 1]} : vector<24x128xf32> to vector<1x128xf32>
    %369 = vector.broadcast %368 : vector<1x128xf32> to vector<8x128xf32>
    %370 = arith.mulf %369, %118 : vector<8x128xf32>
    %371 = arith.mulf %121, %370 : vector<8x128xf32>
    %372 = arith.addf %350, %371 : vector<8x128xf32>
    %373 = vector.extract_strided_slice %119 {offsets = [8, 0], sizes = [1, 128], strides = [1, 1]} : vector<24x128xf32> to vector<1x128xf32>
    %374 = vector.broadcast %373 : vector<1x128xf32> to vector<8x128xf32>
    %375 = arith.mulf %374, %118 : vector<8x128xf32>
    %376 = arith.mulf %123, %375 : vector<8x128xf32>
    %377 = arith.addf %338, %376 : vector<8x128xf32>
    %378 = arith.mulf %125, %375 : vector<8x128xf32>
    %379 = arith.subf %360, %378 : vector<8x128xf32>
    %380 = arith.mulf %127, %375 : vector<8x128xf32>
    %381 = arith.addf %362, %380 : vector<8x128xf32>
    %382 = vector.extract_strided_slice %119 {offsets = [12, 0], sizes = [1, 128], strides = [1, 1]} : vector<24x128xf32> to vector<1x128xf32>
    %383 = vector.broadcast %382 : vector<1x128xf32> to vector<8x128xf32>
    %384 = arith.mulf %383, %118 : vector<8x128xf32>
    %385 = arith.mulf %129, %384 : vector<8x128xf32>
    %386 = arith.subf %343, %385 : vector<8x128xf32>
    %387 = arith.mulf %131, %384 : vector<8x128xf32>
    %388 = arith.addf %345, %387 : vector<8x128xf32>
    %389 = arith.mulf %133, %384 : vector<8x128xf32>
    %390 = arith.subf %367, %389 : vector<8x128xf32>
    %391 = vector.extract_strided_slice %119 {offsets = [16, 0], sizes = [1, 128], strides = [1, 1]} : vector<24x128xf32> to vector<1x128xf32>
    %392 = vector.broadcast %391 : vector<1x128xf32> to vector<8x128xf32>
    %393 = arith.mulf %392, %118 : vector<8x128xf32>
    %394 = arith.mulf %135, %393 : vector<8x128xf32>
    %395 = arith.subf %355, %394 : vector<8x128xf32>
    %c0_67 = arith.constant 0 : index
    %c0_68 = arith.constant 0 : index
    %c0_69 = arith.constant 0 : index
    %396 = vector.load %arg7[%c0_67, %c0_68, %c0_69] : memref<8x8x128xf32, #tpu.memory_space<vmem>>, vector<1x8x128xf32>
    %397 = vector.shape_cast %396 : vector<1x8x128xf32> to vector<8x128xf32>
    %398 = vector.shape_cast %395 : vector<8x128xf32> to vector<1x8x128xf32>
    tpu.vector_store %arg7[%c0_67, %c0_68, %c0_69], %398 {strides = array<i32>} : memref<8x8x128xf32, #tpu.memory_space<vmem>>, vector<1x8x128xf32>,
    %c1_70 = arith.constant 1 : index
    %c0_71 = arith.constant 0 : index
    %c0_72 = arith.constant 0 : index
    %399 = vector.load %arg7[%c1_70, %c0_71, %c0_72] : memref<8x8x128xf32, #tpu.memory_space<vmem>>, vector<1x8x128xf32>
    %400 = vector.shape_cast %399 : vector<1x8x128xf32> to vector<8x128xf32>
    %401 = vector.shape_cast %390 : vector<8x128xf32> to vector<1x8x128xf32>
    tpu.vector_store %arg7[%c1_70, %c0_71, %c0_72], %401 {strides = array<i32>} : memref<8x8x128xf32, #tpu.memory_space<vmem>>, vector<1x8x128xf32>,
    %c2_73 = arith.constant 2 : index
    %c0_74 = arith.constant 0 : index
    %c0_75 = arith.constant 0 : index
    %402 = vector.load %arg7[%c2_73, %c0_74, %c0_75] : memref<8x8x128xf32, #tpu.memory_space<vmem>>, vector<1x8x128xf32>
    %403 = vector.shape_cast %402 : vector<1x8x128xf32> to vector<8x128xf32>
    %404 = vector.shape_cast %388 : vector<8x128xf32> to vector<1x8x128xf32>
    tpu.vector_store %arg7[%c2_73, %c0_74, %c0_75], %404 {strides = array<i32>} : memref<8x8x128xf32, #tpu.memory_space<vmem>>, vector<1x8x128xf32>,
    %c3_76 = arith.constant 3 : index
    %c0_77 = arith.constant 0 : index
    %c0_78 = arith.constant 0 : index
    %405 = vector.load %arg7[%c3_76, %c0_77, %c0_78] : memref<8x8x128xf32, #tpu.memory_space<vmem>>, vector<1x8x128xf32>
    %406 = vector.shape_cast %405 : vector<1x8x128xf32> to vector<8x128xf32>
    %407 = vector.shape_cast %386 : vector<8x128xf32> to vector<1x8x128xf32>
    tpu.vector_store %arg7[%c3_76, %c0_77, %c0_78], %407 {strides = array<i32>} : memref<8x8x128xf32, #tpu.memory_space<vmem>>, vector<1x8x128xf32>,
    %c4_79 = arith.constant 4 : index
    %c0_80 = arith.constant 0 : index
    %c0_81 = arith.constant 0 : index
    %408 = vector.load %arg7[%c4_79, %c0_80, %c0_81] : memref<8x8x128xf32, #tpu.memory_space<vmem>>, vector<1x8x128xf32>
    %409 = vector.shape_cast %408 : vector<1x8x128xf32> to vector<8x128xf32>
    %410 = vector.shape_cast %381 : vector<8x128xf32> to vector<1x8x128xf32>
    tpu.vector_store %arg7[%c4_79, %c0_80, %c0_81], %410 {strides = array<i32>} : memref<8x8x128xf32, #tpu.memory_space<vmem>>, vector<1x8x128xf32>,
    %c5_82 = arith.constant 5 : index
    %c0_83 = arith.constant 0 : index
    %c0_84 = arith.constant 0 : index
    %411 = vector.load %arg7[%c5_82, %c0_83, %c0_84] : memref<8x8x128xf32, #tpu.memory_space<vmem>>, vector<1x8x128xf32>
    %412 = vector.shape_cast %411 : vector<1x8x128xf32> to vector<8x128xf32>
    %413 = vector.shape_cast %379 : vector<8x128xf32> to vector<1x8x128xf32>
    tpu.vector_store %arg7[%c5_82, %c0_83, %c0_84], %413 {strides = array<i32>} : memref<8x8x128xf32, #tpu.memory_space<vmem>>, vector<1x8x128xf32>,
    %c6_85 = arith.constant 6 : index
    %c0_86 = arith.constant 0 : index
    %c0_87 = arith.constant 0 : index
    %414 = vector.load %arg7[%c6_85, %c0_86, %c0_87] : memref<8x8x128xf32, #tpu.memory_space<vmem>>, vector<1x8x128xf32>
    %415 = vector.shape_cast %414 : vector<1x8x128xf32> to vector<8x128xf32>
    %416 = vector.shape_cast %377 : vector<8x128xf32> to vector<1x8x128xf32>
    tpu.vector_store %arg7[%c6_85, %c0_86, %c0_87], %416 {strides = array<i32>} : memref<8x8x128xf32, #tpu.memory_space<vmem>>, vector<1x8x128xf32>,
    %c7_88 = arith.constant 7 : index
    %c0_89 = arith.constant 0 : index
    %c0_90 = arith.constant 0 : index
    %417 = vector.load %arg7[%c7_88, %c0_89, %c0_90] : memref<8x8x128xf32, #tpu.memory_space<vmem>>, vector<1x8x128xf32>
    %418 = vector.shape_cast %417 : vector<1x8x128xf32> to vector<8x128xf32>
    %419 = vector.shape_cast %372 : vector<8x128xf32> to vector<1x8x128xf32>
    tpu.vector_store %arg7[%c7_88, %c0_89, %c0_90], %419 {strides = array<i32>} : memref<8x8x128xf32, #tpu.memory_space<vmem>>, vector<1x8x128xf32>,
    return
  }
  func.func @transform_0(%arg0: i32, %arg1: i32) -> (i32, i32, i32) {
    %c0_i32 = arith.constant 0 : i32
    %c0_i32_0 = arith.constant 0 : i32
    %c0_i32_1 = arith.constant 0 : i32
    return %c0_i32, %arg1, %c0_i32_0 : i32, i32, i32
  }
  func.func @transform_1(%arg0: i32, %arg1: i32) -> (i32, i32, i32) {
    %c0_i32 = arith.constant 0 : i32
    %c0_i32_0 = arith.constant 0 : i32
    %c0_i32_1 = arith.constant 0 : i32
    return %c0_i32, %c0_i32_0, %arg0 : i32, i32, i32
  }
  func.func @transform_2(%arg0: i32, %arg1: i32) -> (i32, i32) {
    %c0_i32 = arith.constant 0 : i32
    %c0_i32_0 = arith.constant 0 : i32
    return %c0_i32, %arg0 : i32, i32
  }
  func.func @transform_3(%arg0: i32, %arg1: i32) -> (i32, i32) {
    %c0_i32 = arith.constant 0 : i32
    %c0_i32_0 = arith.constant 0 : i32
    return %c0_i32, %arg0 : i32, i32
  }
  func.func @transform_4(%arg0: i32, %arg1: i32) -> (i32, i32) {
    %c0_i32 = arith.constant 0 : i32
    %c0_i32_0 = arith.constant 0 : i32
    return %c0_i32, %arg0 : i32, i32
  }
  func.func @transform_5(%arg0: i32, %arg1: i32) -> (i32, i32, i32) {
    %c0_i32 = arith.constant 0 : i32
    %c0_i32_0 = arith.constant 0 : i32
    return %c0_i32, %arg1, %arg0 : i32, i32, i32
  }
}

</mosaic_0001>

<bundles_post_ra>
// kernel: steerable_geometric_product.1
= control target key start
LH: loop header
LB: loop body
LE: loop exit
PB: predicated region body
PF: predicated region fallthrough
CT: control target
= control target key end

     0   :  { %v1283_v1 = vmov 0   ;;  %s1954_s1 = inlined_call_operand.vmem [shape: bf16[4,128,256], index: 1, kind: input, shape index: {}]   ;;  %s1955_s0 = inlined_call_operand.vmem [shape: f32[8,8,128], index: 0, kind: input, shape index: {}]   ;;  %s1956_s3 = inlined_call_operand.vmem [shape: f32[4,128], index: 3, kind: input, shape index: {}]   ;;  %s1957_s4 = inlined_call_operand.vmem [shape: f32[24,128], index: 4, kind: input, shape index: {}]   ;;  %s1958_s2 = inlined_call_operand.vmem [shape: f32[1,128], index: 2, kind: input, shape index: {}]   ;;  %s1959_s5 = inlined_call_operand.vmem [shape: f32[8,8,128], index: 5, kind: output, shape index: {}]  }
   0x1   :  { %v1163_v0 = vld [vmem:[%s1954_s1 + $0x74] ss:$8 sps:$4 sm:$0xff]   ;;  %151 = vmatprep.mubr.bf16.mxu0 %v1283_v1  ;;  %330 = vmatprep.mubr.bf16.mxu1 %v1283_v1  ;;  %v1167_v3 = vld [vmem:[%s1954_s1 + $0x70] ss:$8 sps:$4 sm:$0xff]   ;;  %v1169_v5 = vld [vmem:[%s1954_s1 + $0x64] ss:$8 sps:$4 sm:$0xff]  }
   0x2   :  { %v1165_v2 = vld [vmem:[%s1954_s1 + $0xf4] ss:$8 sps:$4 sm:$0xff]   ;;  %119 = vmatprep.subr.bf16.mxu0 %v1163_v0  ;;  %v1168_v4 = vld [vmem:[%s1954_s1 + $0xf0] ss:$8 sps:$4 sm:$0xff]   ;;  %v1171_v6 = vld [vmem:[%s1954_s1 + $0xe4] ss:$8 sps:$4 sm:$0xff]  }
   0x3   :  { %298 = vmatprep.subr.bf16.mxu1 %v1165_v2  ;;  %120 = vmatpush1.bf16.msra.mxu0 %v1167_v3  ;;  %v1173_v7 = vld [vmem:[%s1954_s1 + $0x60] ss:$8 sps:$4 sm:$0xff]   ;;  %v1175_v9 = vld [vmem:[%s1954_s1 + $0x54] ss:$8 sps:$4 sm:$0xff]   ;;  %v1179_v11 = vld [vmem:[%s1954_s1 + $0x50] ss:$8 sps:$4 sm:$0xff]  }
   0x4   :  { %299 = vmatpush1.bf16.msra.mxu1 %v1168_v4  ;;  %121 = vmatprep.subr.bf16.mxu0 %v1169_v5  ;;  %v1174_v8 = vld [vmem:[%s1954_s1 + $0xe0] ss:$8 sps:$4 sm:$0xff]   ;;  %v1177_v10 = vld [vmem:[%s1954_s1 + $0xd4] ss:$8 sps:$4 sm:$0xff]   ;;  %v1180_v12 = vld [vmem:[%s1954_s1 + $0xd0] ss:$8 sps:$4 sm:$0xff]  }
   0x5   :  { %300 = vmatprep.subr.bf16.mxu1 %v1171_v6  ;;  %v1181_v13 = vld [vmem:[%s1954_s1 + $0x44] ss:$8 sps:$4 sm:$0xff]   ;;  %v1185_v15 = vld [vmem:[%s1954_s1 + $0x40] ss:$8 sps:$4 sm:$0xff]   ;;  %v1187_v17 = vld [vmem:[%s1954_s1 + $0x34] ss:$8 sps:$4 sm:$0xff]  }
   0x6   :  { %v1183_v14 = vld [vmem:[%s1954_s1 + $0xc4] ss:$8 sps:$4 sm:$0xff]   ;;  %v1186_v16 = vld [vmem:[%s1954_s1 + $0xc0] ss:$8 sps:$4 sm:$0xff]   ;;  %v1189_v18 = vld [vmem:[%s1954_s1 + $0xb4] ss:$8 sps:$4 sm:$0xff]  }
   0x7   :  { %122 = vmatpush1.bf16.msra.mxu0 %v1173_v7  ;;  %v1191_v19 = vld [vmem:[%s1954_s1 + $0x30] ss:$8 sps:$4 sm:$0xff]   ;;  %v1193_v21 = vld [vmem:[%s1954_s1 + $0x24] ss:$8 sps:$4 sm:$0xff]   ;;  %v1197_v23 = vld [vmem:[%s1954_s1 + $0x20] ss:$8 sps:$4 sm:$0xff]  }
   0x8   :  { %301 = vmatpush1.bf16.msra.mxu1 %v1174_v8  ;;  %123 = vmatprep.subr.bf16.mxu0 %v1175_v9  ;;  %v1192_v20 = vld [vmem:[%s1954_s1 + $0xb0] ss:$8 sps:$4 sm:$0xff]   ;;  %v1195_v22 = vld [vmem:[%s1954_s1 + $0xa4] ss:$8 sps:$4 sm:$0xff]   ;;  %v1198_v24 = vld [vmem:[%s1954_s1 + $0xa0] ss:$8 sps:$4 sm:$0xff]  }
   0x9   :  { %302 = vmatprep.subr.bf16.mxu1 %v1177_v10  ;;  %v1199_v25 = vld [vmem:[%s1954_s1 + $0x14] ss:$8 sps:$4 sm:$0xff]   ;;  %v1203_v27 = vld [vmem:[%s1954_s1 + $0x10] ss:$8 sps:$4 sm:$0xff]   ;;  %v1205_v29 = vld [vmem:[%s1954_s1 + $0x4] ss:$8 sps:$4 sm:$0xff]  }
   0xa   :  { %v1201_v26 = vld [vmem:[%s1954_s1 + $0x94] ss:$8 sps:$4 sm:$0xff]   ;;  %v1204_v28 = vld [vmem:[%s1954_s1 + $0x90] ss:$8 sps:$4 sm:$0xff]   ;;  %v1207_v30 = vld [vmem:[%s1954_s1 + $0x84] ss:$8 sps:$4 sm:$0xff]  }
   0xb   :  { %124 = vmatpush1.bf16.msra.mxu0 %v1179_v11  ;;  %v1209_v31 = vld [vmem:[%s1954_s1] ss:$8 sps:$4 sm:$0xff]   ;;  %v1425_v35 = vld [vmem:[%s1955_s0 + $0x10] sm:$0xff]  ;;  %v1219_v42 = vld [vmem:[%s1954_s1 + $0x164] ss:$8 sps:$4 sm:$0xff]  }
   0xc   :  { %303 = vmatpush1.bf16.msra.mxu1 %v1180_v12  ;;  %125 = vmatprep.subr.bf16.mxu0 %v1181_v13  ;;  %v1210_v32 = vld [vmem:[%s1954_s1 + $0x80] ss:$8 sps:$4 sm:$0xff]   ;;  %v1213_v36 = vld [vmem:[%s1954_s1 + $0x174] ss:$8 sps:$4 sm:$0xff]   ;;  %v1211_v40 = vld [vmem:[%s1954_s1 + $0x170] ss:$8 sps:$4 sm:$0xff]  }
   0xd   :  { %304 = vmatprep.subr.bf16.mxu1 %v1183_v14  ;;  %v1415_v33 = vld [vmem:[%s1955_s0] sm:$0xff]  ;;  %v1420_v34 = vld [vmem:[%s1955_s0 + $0x8] sm:$0xff]  ;;  %v1216_v37 = vld [vmem:[%s1954_s1 + $0x1f4] ss:$8 sps:$4 sm:$0xff]  }
   0xe   :  { %v22_v38 = vpack.c.bf16 %v1415_v33, %v1415_v33  ;;  %v199_v39 = vpack.c.bf16 %v1425_v35, %v1420_v34  ;;  %v1214_v41 = vld [vmem:[%s1954_s1 + $0x1f0] ss:$8 sps:$4 sm:$0xff]   ;;  %v1222_v43 = vld [vmem:[%s1954_s1 + $0x1e4] ss:$8 sps:$4 sm:$0xff]   ;;  %v1217_v44 = vld [vmem:[%s1954_s1 + $0x160] ss:$8 sps:$4 sm:$0xff]  }
   0xf   :  { %126 = vmatpush1.bf16.msra.mxu0 %v1185_v15  ;;  %v1220_v45 = vld [vmem:[%s1954_s1 + $0x1e0] ss:$8 sps:$4 sm:$0xff]   ;;  %v1458_v46 = vld [vmem:[%s1955_s0 + $0x18] sm:$0xff]  ;;  %v1231_v52 = vld [vmem:[%s1954_s1 + $0x144] ss:$8 sps:$4 sm:$0xff]  }
  0x10   :  { %305 = vmatpush1.bf16.msra.mxu1 %v1186_v16  ;;  %127 = vmatprep.subr.bf16.mxu0 %v1187_v17  ;;  %v1225_v47 = vld [vmem:[%s1954_s1 + $0x154] ss:$8 sps:$4 sm:$0xff]   ;;  %v200_v49 = vpack.c.bf16 %v1458_v46, %v1458_v46  ;;  %v1223_v50 = vld [vmem:[%s1954_s1 + $0x150] ss:$8 sps:$4 sm:$0xff]   ;;  %v1234_v53 = vld [vmem:[%s1954_s1 + $0x1c4] ss:$8 sps:$4 sm:$0xff]  }
  0x11   :  { %306 = vmatprep.subr.bf16.mxu1 %v1189_v18  ;;  %v1228_v48 = vld [vmem:[%s1954_s1 + $0x1d4] ss:$8 sps:$4 sm:$0xff]   ;;  %v1226_v51 = vld [vmem:[%s1954_s1 + $0x1d0] ss:$8 sps:$4 sm:$0xff]   ;;  %v1229_v54 = vld [vmem:[%s1954_s1 + $0x140] ss:$8 sps:$4 sm:$0xff]  }
  0x12   :  { %v1232_v55 = vld [vmem:[%s1954_s1 + $0x1c0] ss:$8 sps:$4 sm:$0xff]   ;;  %v1237_v56 = vld [vmem:[%s1954_s1 + $0x134] ss:$8 sps:$4 sm:$0xff]   ;;  %v1235_v58 = vld [vmem:[%s1954_s1 + $0x130] ss:$8 sps:$4 sm:$0xff]  }
  0x13   :  { %128 = vmatpush1.bf16.msra.mxu0 %v1191_v19  ;;  %v1240_v57 = vld [vmem:[%s1954_s1 + $0x1b4] ss:$8 sps:$4 sm:$0xff]   ;;  %v1238_v59 = vld [vmem:[%s1954_s1 + $0x1b0] ss:$8 sps:$4 sm:$0xff]   ;;  %v1243_v60 = vld [vmem:[%s1954_s1 + $0x124] ss:$8 sps:$4 sm:$0xff]  }
  0x14   :  { %307 = vmatpush1.bf16.msra.mxu1 %v1192_v20  ;;  %129 = vmatprep.subr.bf16.mxu0 %v1193_v21  ;;  %v1246_v61 = vld [vmem:[%s1954_s1 + $0x1a4] ss:$8 sps:$4 sm:$0xff]   ;;  %v1241_v62 = vld [vmem:[%s1954_s1 + $0x120] ss:$8 sps:$4 sm:$0xff]   ;;  %v1249_v0 = vld [vmem:[%s1954_s1 + $0x114] ss:$8 sps:$4 sm:$0xff]  }
  0x15   :  { %308 = vmatprep.subr.bf16.mxu1 %v1195_v22  ;;  %v1244_v63 = vld [vmem:[%s1954_s1 + $0x1a0] ss:$8 sps:$4 sm:$0xff]   ;;  %v1252_v2 = vld [vmem:[%s1954_s1 + $0x194] ss:$8 sps:$4 sm:$0xff]   ;;  %v1247_v3 = vld [vmem:[%s1954_s1 + $0x110] ss:$8 sps:$4 sm:$0xff]  }
  0x16   :  { %v1250_v4 = vld [vmem:[%s1954_s1 + $0x190] ss:$8 sps:$4 sm:$0xff]   ;;  %v1255_v5 = vld [vmem:[%s1954_s1 + $0x104] ss:$8 sps:$4 sm:$0xff]   ;;  %v1253_v7 = vld [vmem:[%s1954_s1 + $0x100] ss:$8 sps:$4 sm:$0xff]  }
  0x17   :  { %130 = vmatpush1.bf16.msra.mxu0 %v1197_v23  ;;  %v1258_v6 = vld [vmem:[%s1954_s1 + $0x184] ss:$8 sps:$4 sm:$0xff]   ;;  %v1256_v8 = vld [vmem:[%s1954_s1 + $0x180] ss:$8 sps:$4 sm:$0xff]   ;;  %v1550_v11 = vld [vmem:[%s1955_s0 + $0x38] sm:$0xff] }
  0x18   :  { %309 = vmatpush1.bf16.msra.mxu1 %v1198_v24  ;;  %131 = vmatprep.subr.bf16.mxu0 %v1199_v25  ;;  %v1540_v9 = vld [vmem:[%s1955_s0 + $0x20] sm:$0xff]  ;;  %v1545_v10 = vld [vmem:[%s1955_s0 + $0x28] sm:$0xff]  ;;  %v571_v13 = vpack.c.bf16 %v1550_v11, %v1550_v11  ;;  %v1560_v14 = vld [vmem:[%s1955_s0 + $0x30] sm:$0xff] }
  0x19   :  { %310 = vmatprep.subr.bf16.mxu1 %v1201_v26  ;;  %v386_v12 = vpack.c.bf16 %v1545_v10, %v1540_v9  ;;  %v387_v15 = vpack.c.bf16 %v1560_v14, %v1560_v14 }
  0x1b   :  { %132 = vmatpush1.bf16.msra.mxu0 %v1203_v27 }
  0x1c   :  { %311 = vmatpush1.bf16.msra.mxu1 %v1204_v28  ;;  %133 = vmatprep.subr.bf16.mxu0 %v1205_v29 }
  0x1d   :  { %312 = vmatprep.subr.bf16.mxu1 %v1207_v30 }
  0x1f   :  { %134 = vmatpush1.bf16.msra.mxu0 %v1209_v31 }
  0x20   :  { %313 = vmatpush1.bf16.msra.mxu1 %v1210_v32  ;;  %485 = vmatprep.subr.bf16.mxu0 %v1213_v36 }
  0x21   :  { %669 = vmatprep.subr.bf16.mxu1 %v1216_v37 }
  0x22   :  { %152 = vmatmul.mubr.bf16.vlgmr.msra.gmra.mxu0 %v22_v38 }
  0x23   :  { %331 = vmatmul.mubr.bf16.vlgmr.msra.gmra.mxu1 %v199_v39  ;;  %486 = vmatpush1.bf16.msra.mxu0 %v1211_v40 }
  0x24   :  { %670 = vmatpush1.bf16.msra.mxu1 %v1214_v41  ;;  %487 = vmatprep.subr.bf16.mxu0 %v1219_v42 }
  0x25   :  { %671 = vmatprep.subr.bf16.mxu1 %v1222_v43  ;;  %340 = vmatprep.mubr.bf16.mxu1 %v1283_v1 }
  0x26   :  { %517 = vmatprep.mubr.bf16.mxu0 %v1283_v1 }
  0x27   :  { %488 = vmatpush1.bf16.msra.mxu0 %v1217_v44 }
  0x28   :  { %672 = vmatpush1.bf16.msra.mxu1 %v1220_v45  ;;  %489 = vmatprep.subr.bf16.mxu0 %v1225_v47 }
  0x29   :  { %673 = vmatprep.subr.bf16.mxu1 %v1228_v48 }
  0x2b   :  { %341 = vmatmul.mubr.bf16.gmra.mxu1 %v200_v49  ;;  %490 = vmatpush1.bf16.msra.mxu0 %v1223_v50 }
  0x2c   :  { %674 = vmatpush1.bf16.msra.mxu1 %v1226_v51  ;;  %491 = vmatprep.subr.bf16.mxu0 %v1231_v52 }
  0x2d   :  { %675 = vmatprep.subr.bf16.mxu1 %v1234_v53  ;;  %701 = vmatprep.mubr.bf16.mxu1 %v1283_v1 }
  0x2f   :  { %492 = vmatpush1.bf16.msra.mxu0 %v1229_v54 }
  0x30   :  { %676 = vmatpush1.bf16.msra.mxu1 %v1232_v55  ;;  %493 = vmatprep.subr.bf16.mxu0 %v1237_v56 }
  0x31   :  { %677 = vmatprep.subr.bf16.mxu1 %v1240_v57 }
  0x33   :  { %494 = vmatpush1.bf16.msra.mxu0 %v1235_v58 }
  0x34   :  { %678 = vmatpush1.bf16.msra.mxu1 %v1238_v59  ;;  %495 = vmatprep.subr.bf16.mxu0 %v1243_v60 }
  0x35   :  { %679 = vmatprep.subr.bf16.mxu1 %v1246_v61 }
  0x37   :  { %496 = vmatpush1.bf16.msra.mxu0 %v1241_v62 }
  0x38   :  { %680 = vmatpush1.bf16.msra.mxu1 %v1244_v63  ;;  %497 = vmatprep.subr.bf16.mxu0 %v1249_v0 }
  0x39   :  { %681 = vmatprep.subr.bf16.mxu1 %v1252_v2 }
  0x3b   :  { %498 = vmatpush1.bf16.msra.mxu0 %v1247_v3 }
  0x3c   :  { %682 = vmatpush1.bf16.msra.mxu1 %v1250_v4  ;;  %499 = vmatprep.subr.bf16.mxu0 %v1255_v5 }
  0x3d   :  { %683 = vmatprep.subr.bf16.mxu1 %v1258_v6 }
  0x3f   :  { %500 = vmatpush1.bf16.msra.mxu0 %v1253_v7 }
  0x40   :  { %684 = vmatpush1.bf16.msra.mxu1 %v1256_v8 }
  0x42   :  { %518 = vmatmul.mubr.bf16.vlgmr.msra.gmra.mxu0 %v386_v12  ;;  %v1038_v12 = vld [vmem:[%s1956_s3] ss:$0 sm:$0xff] }
  0x43   :  { %702 = vmatmul.mubr.bf16.vlgmr.msra.gmra.mxu1 %v571_v13  ;;  %527 = vmatprep.mubr.bf16.mxu0 %v1283_v1 }
  0x4a   :  { %528 = vmatmul.mubr.bf16.gmra.mxu0 %v387_v15 }
  0xe2   :  { %v1564_v16 = vpop.f32.mrf.mxu0 }
  0xe3   :  { %v1566_v17 = vpop.f32.mrf.mxu1  ;;  %v160_v18 = vmul.f32 %v1564_v16, %v1564_v16 }
  0xe4   :  { %v1570_v19 = vpop.f32.mrf.mxu0  ;;  %v349_v21 = vmul.f32 %v1566_v17, %v1566_v17 }
  0xe5   :  { %v1572_v20 = vpop.f32.mrf.mxu1  ;;  %v161_v1 = vmul.f32 %v160_v18, %v160_v18 }
  0xe6   :  { %v157_v22 = vpop.f32.mrf.mxu0 }
  0xe7   :  { %v1576_v23 = vpop.f32.mrf.mxu1  ;;  %v162_v24 = vadd.f32 1e-16, %v161_v1 }
  0xe8   :  { %v350_v25 = vmul.f32 %v1576_v23, %v1576_v23  ;;  %v158_v26 = vpop.f32.mrf.mxu0 }
  0xe9   :  { %v1580_v27 = vpop.f32.mrf.mxu1  ;;  %1259 = vrsqrt.f32 %v162_v24  ;;  %vm165_vm0 = vcmp.eq.f32.partialorder %v162_v24, inf  ;;  %v168_v42 = vand.u32 2147483648, %v162_v24  ;;  %vm167_vm1 = vcmp.eq.f32.partialorder %v162_v24, 0.0 }
  0xea   :  { %v351_v28 = vadd.f32 %v350_v25, %v349_v21 }
  0xeb   :  { %v1582_v29 = vpop.f32.mrf.mxu1 }
  0xec   :  { %v352_v30 = vmul.f32 %v1582_v29, %v1582_v29 }
  0xed   :  { %v1586_v31 = vpop.f32.mrf.mxu1 }
  0xee   :  { %v353_v32 = vadd.f32 %v352_v30, %v351_v28  ;;  %v750_v30 = vlaneseq }
  0xef   :  { %v346_v36 = vpop.f32.mrf.mxu1 }
  0xf0   :  { %v354_v37 = vmul.f32 %v353_v32, %v353_v32 }
  0xf1   :  { %v347_v38 = vpop.f32.mrf.mxu1 }
  0xf2   :  { %v355_v39 = vadd.f32 1e-16, %v354_v37  ;;  %v1076_v38 = vld [vmem:[%s1956_s3 + $0x1] ss:$0 sm:$0xff] }
  0xf4   :  { %1261 = vrsqrt.f32 %v355_v39  ;;  %vm358_vm2 = vcmp.eq.f32.partialorder %v355_v39, inf  ;;  %v361_v48 = vand.u32 2147483648, %v355_v39  ;;  %vm360_vm3 = vcmp.eq.f32.partialorder %v355_v39, 0.0 }
  0xf6   :  { %v1260_v40 = vpop.eup %1259 }
  0xf7   :  { %v164_v41 = vmul.f32 %v1260_v40, %v162_v24 }
  0xf9   :  { %v166_v43 = vsel %vm165_vm0, %v162_v24, %v164_v41  ;;  %v1621_v41 = vshrl.u32 %v750_v30, 7 }
  0xfa   :  { %v169_v44 = vsel %vm167_vm1, %v168_v42, %v166_v43 }
  0xfb   :  { %1263 = vrsqrt.f32 %v169_v44  ;;  %vm172_vm4 = vcmp.eq.f32.partialorder %v169_v44, inf  ;;  %v175_v3 = vand.u32 2147483648, %v169_v44  ;;  %vm174_vm5 = vcmp.eq.f32.partialorder %v169_v44, 0.0 }
 0x101   :  { %v1262_v45 = vpop.eup %1261 }
 0x102   :  { %v357_v47 = vmul.f32 %v1262_v45, %v355_v39  ;;  %v1588_v49 = vpop.f32.mrf.mxu0 }
 0x103   :  { %v1590_v50 = vpop.f32.mrf.mxu1  ;;  %v536_v2 = vmul.f32 %v1588_v49, %v1588_v49 }
 0x104   :  { %v359_v51 = vsel %vm358_vm2, %v355_v39, %v357_v47  ;;  %v710_v52 = vmul.f32 %v1590_v50, %v1590_v50  ;;  %v1594_v54 = vpop.f32.mrf.mxu0 }
 0x105   :  { %v362_v53 = vsel %vm360_vm3, %v361_v48, %v359_v51  ;;  %v1596_v55 = vpop.f32.mrf.mxu1  ;;  %v1624_v48 = vsub.s32 0, %v1621_v41  ;;  %v759_v51 = vsub.s32 5, %v1621_v41 }
 0x106   :  { %1265 = vrsqrt.f32 %v362_v53  ;;  %v711_v56 = vmul.f32 %v710_v52, %v710_v52  ;;  %v1598_v57 = vpop.f32.mrf.mxu0  ;;  %vm365_vm6 = vcmp.eq.f32.partialorder %v362_v53, inf  ;;  %v368_v36 = vand.u32 2147483648, %v362_v53 }
 0x107   :  { %v707_v58 = vpop.f32.mrf.mxu1  ;;  %v537_v59 = vmul.f32 %v1598_v57, %v1598_v57  ;;  %vm367_vm7 = vcmp.eq.f32.partialorder %v362_v53, 0.0 }
 0x108   :  { %v1264_v60 = vpop.eup %1263  ;;  %v712_v61 = vadd.f32 1e-16, %v711_v56  ;;  %v1602_v62 = vpop.f32.mrf.mxu0  ;;  %v1632_v56 = vld [vmem:[%s1957_s4] sm:$0xff]  ;;  %v1637_v58 = vld [vmem:[%s1957_s4 + $0x8] sm:$0xff] }
 0x109   :  { %v708_v63 = vpop.f32.mrf.mxu1  ;;  %v171_v0 = vmul.f32 %v1264_v60, %v169_v44  ;;  %v538_v6 = vadd.f32 %v537_v59, %v536_v2  ;;  %v1641_v59 = vsub.s32 3, %v1621_v41  ;;  %v1644_v60 = vsub.s32 1, %v1621_v41 }
 0x10a   :  { %1267 = vrsqrt.f32 %v712_v61  ;;  %v1606_v4 = vpop.f32.mrf.mxu0  ;;  %vm715_vm8 = vcmp.eq.f32.partialorder %v712_v61, inf  ;;  %v718_v43 = vand.u32 2147483648, %v712_v61  ;;  %vm717_vm9 = vcmp.eq.f32.partialorder %v712_v61, 0.0 }
 0x10b   :  { %v173_v5 = vsel %vm172_vm4, %v169_v44, %v171_v0  ;;  %v539_v7 = vmul.f32 %v1606_v4, %v1606_v4  ;;  %v753_v63 = vrot.slane %v1632_v56, %v1624_v48  ;;  %v760_v0 = vrot.slane %v1632_v56, %v759_v51 }
 0x10c   :  { %v176_v8 = vsel %vm174_vm5, %v175_v3, %v173_v5  ;;  %v1613_v13 = vpop.f32.mrf.mxu0  ;;  %v771_v2 = vrot.slane %v1637_v58, %v759_v51 }
 0x10d   :  { %v1037_v15 = vadd.f32 -1.0, %v176_v8  ;;  %v540_v18 = vadd.f32 %v539_v7, %v538_v6  ;;  %v1039_v7 = vld [vmem:[%s1958_s2] ss:$0 sm:$0xff]  ;;  %v789_v8 = vrot.slane %v1632_v56, %v1644_v60 }
 0x10e   :  { %v533_v1 = vpop.f32.mrf.mxu0 }
 0x10f   :  { %v183_v21 = vmul.f32 %v1038_v12, %v1037_v15  ;;  %v541_v22 = vmul.f32 %v540_v18, %v540_v18  ;;  %v795_v15 = vsub.s32 4, %v1621_v41  ;;  %v802_v18 = vsub.s32 7, %v1621_v41 }
 0x110   :  { %v534_v24 = vpop.f32.mrf.mxu0  ;;  %v1666_v1 = vsub.s32 2, %v1621_v41 }
 0x111   :  { %v184_v25 = vadd.f32 1.000001, %v183_v21  ;;  %v1615_v26 = vadd.f32 1e-16, %v541_v22  ;;  %v796_v51 = vrot.slane %v1632_v56, %v795_v15 }
 0x113   :  { %v1266_v28 = vpop.eup %1265  ;;  %1269 = vrcp.f32 %v184_v25  ;;  %vm545_vm10 = vcmp.eq.f32.partialorder %v1615_v26, inf  ;;  %v194_v25 = vadd.f32 %v1039_v7, %v1570_v19  ;;  %vm547_vm11 = vcmp.eq.f32.partialorder %v1615_v26, 0.0 }
 0x114   :  { %v364_v32 = vmul.f32 %v1266_v28, %v362_v53  ;;  %1271 = vrsqrt.f32 %v1615_v26  ;;  %v548_v30 = vand.u32 2147483648, %v1615_v26 }
 0x116   :  { %v366_v37 = vsel %vm365_vm6, %v362_v53, %v364_v32 }
 0x117   :  { %v369_v39 = vsel %vm367_vm7, %v368_v36, %v366_v37  ;;  %v1268_v40 = vpop.eup %1267 }
 0x118   :  { %v1075_v42 = vadd.f32 -1.0, %v369_v39  ;;  %v714_v44 = vmul.f32 %v1268_v40, %v712_v61 }
 0x11a   :  { %v376_v45 = vmul.f32 %v1076_v38, %v1075_v42  ;;  %v716_v47 = vsel %vm715_vm8, %v712_v61, %v714_v44  ;;  %v1649_v61 = vld [vmem:[%s1957_s4 + $0x10] sm:$0xff] }
 0x11b   :  { %v1627_v53 = vsel %vm717_vm9, %v718_v43, %v716_v47  ;;  %v782_v12 = vrot.slane %v1649_v61, %v1641_v59 }
 0x11c   :  { %v377_v52 = vadd.f32 1.000001, %v376_v45  ;;  %1273 = vrsqrt.f32 %v1627_v53  ;;  %v812_v45 = vrot.slane %v1637_v58, %v1641_v59  ;;  %vm722_vm12 = vcmp.eq.f32.partialorder %v1627_v53, inf }
 0x11d   :  { %vm724_vm13 = vcmp.eq.f32.partialorder %v1627_v53, 0.0 }
 0x11e   :  { %1275 = vrcp.f32 %v377_v52 }
 0x120   :  { %v1270_v3 = vpop.eup %1269 }
 0x121   :  { %v1272_v5 = vpop.eup %1271  ;;  %v186_v6 = vmul.f32 %v1270_v3, %v1564_v16 }
 0x122   :  { %v544_v21 = vmul.f32 %v1272_v5, %v1615_v26 }
 0x123   :  { %v754_v16 = vmul.f32 %v753_v63, %v186_v6  ;;  %v761_v22 = vmul.f32 %v760_v0, %v186_v6  ;;  %v772_v24 = vmul.f32 %v771_v2, %v186_v6  ;;  %v783_v38 = vmul.f32 %v782_v12, %v186_v6 }
 0x124   :  { %v546_v28 = vsel %vm545_vm10, %v1615_v26, %v544_v21 }
 0x125   :  { %v755_v32 = vmul.f32 %v754_v16, %v1415_v33  ;;  %v764_v36 = vmul.f32 %v1425_v35, %v761_v22  ;;  %v766_v37 = vmul.f32 %v1458_v46, %v761_v22  ;;  %v773_v39 = vmul.f32 %v1540_v9, %v772_v24 }
 0x126   :  { %v775_v40 = vmul.f32 %v1545_v10, %v772_v24  ;;  %v1679_v42 = vsel %vm547_vm11, %v548_v30, %v546_v28  ;;  %v777_v19 = vmul.f32 %v1560_v14, %v772_v24  ;;  %v762_v47 = vmul.f32 %v1420_v34, %v761_v22 }
 0x127   :  { %v756_v43 = vadd.f32 %v755_v32, %v194_v25  ;;  %v765_v44 = vadd.f32 %v764_v36, %v1580_v27  ;;  %v767_v26 = vadd.f32 %v766_v37, %v1586_v31  ;;  %v1691_v52 = vadd.f32 %v773_v39, %v1594_v54 }
 0x128   :  { %v1694_v63 = vadd.f32 %v775_v40, %v1602_v62  ;;  %v1697_v27 = vrot.slane %v1632_v56, %v802_v18  ;;  %1277 = vrsqrt.f32 %v1679_v42  ;;  %v1701_v31 = vadd.f32 %v777_v19, %v1613_v13 }
 0x129   :  { %v1274_v0 = vpop.eup %1273  ;;  %v784_v2 = vmul.f32 %v1550_v11, %v783_v38  ;;  %v1708_v54 = vrot.slane %v1649_v61, %v1666_v1  ;;  %v1711_v62 = vrot.slane %v1637_v58, %v802_v18  ;;  %v763_v21 = vadd.f32 %v762_v47, %v1572_v20  ;;  %v1148_v47 = vld [vmem:[%s1956_s3 + $0x3] ss:$0 sm:$0xff] }
 0x12a   :  { %v721_v5 = vmul.f32 %v1274_v0, %v1627_v53  ;;  %v725_v18 = vand.u32 2147483648, %v1627_v53  ;;  %vm552_vm14 = vcmp.eq.f32.partialorder %v1679_v42, inf  ;;  %vm554_vm15 = vcmp.eq.f32.partialorder %v1679_v42, 0.0 }
 0x12b   :  { %v1276_v3 = vpop.eup %1275  ;;  %v1723_v12 = vadd.f32 %v784_v2, %v1596_v55 }
 0x12c   :  { %v1714_v6 = vmul.f32 %v1276_v3, %v1582_v29  ;;  %v1717_v13 = vmul.f32 %v1276_v3, %v1566_v17  ;;  %v1720_v7 = vmul.f32 %v1276_v3, %v1576_v23  ;;  %v723_v16 = vsel %vm722_vm12, %v1627_v53, %v721_v5 }
 0x12d   :  { %v726_v25 = vsel %vm724_vm13, %v725_v18, %v723_v16 }
 0x12e   :  { %v790_v29 = vmul.f32 %v789_v8, %v1717_v13  ;;  %v813_v22 = vmul.f32 %v812_v45, %v1717_v13  ;;  %v832_v17 = vmul.f32 %v789_v8, %v1720_v7  ;;  %v843_v23 = vmul.f32 %v812_v45, %v1720_v7 }
 0x12f   :  { %v854_v24 = vmul.f32 %v789_v8, %v1714_v6  ;;  %v865_v55 = vmul.f32 %v812_v45, %v1714_v6  ;;  %v797_v20 = vmul.f32 %v796_v51, %v1717_v13  ;;  %v1147_v0 = vadd.f32 -1.0, %v726_v25 }
 0x130   :  { %v791_v28 = vmul.f32 %v790_v29, %v1415_v33  ;;  %v814_v30 = vmul.f32 %v1540_v9, %v813_v22  ;;  %v816_v53 = vmul.f32 %v1545_v10, %v813_v22  ;;  %v833_v32 = vmul.f32 %v832_v17, %v1415_v33 }
 0x131   :  { %v844_v36 = vmul.f32 %v1540_v9, %v843_v23  ;;  %v846_v37 = vmul.f32 %v1560_v14, %v843_v23  ;;  %v855_v38 = vmul.f32 %v854_v24, %v1415_v33  ;;  %v866_v8 = vmul.f32 %v1545_v10, %v865_v55 }
 0x132   :  { %v792_v39 = vadd.f32 %v791_v28, %v763_v21  ;;  %v815_v40 = vsub.f32 %v765_v44, %v814_v30  ;;  %v817_v19 = vsub.f32 %v767_v26, %v816_v53  ;;  %v868_v45 = vmul.f32 %v1560_v14, %v865_v55 }
 0x133   :  { %v798_v2 = vmul.f32 %v1420_v34, %v797_v20  ;;  %v835_v3 = vmul.f32 %v796_v51, %v1720_v7  ;;  %v857_v5 = vmul.f32 %v796_v51, %v1714_v6  ;;  %v804_v44 = vmul.f32 %v1697_v27, %v1717_v13 }
 0x134   :  { %v834_v16 = vadd.f32 %v833_v32, %v815_v40  ;;  %v845_v18 = vadd.f32 %v844_v36, %v792_v39  ;;  %v847_v21 = vsub.f32 %v817_v19, %v846_v37  ;;  %v733_v26 = vmul.f32 %v1148_v47, %v1147_v0 }
 0x135   :  { %v799_v29 = vadd.f32 %v798_v2, %v756_v43  ;;  %v836_v22 = vmul.f32 %v1425_v35, %v835_v3  ;;  %v858_v17 = vmul.f32 %v1458_v46, %v857_v5  ;;  %v805_v51 = vmul.f32 %v1425_v35, %v804_v44  ;;  %v1278_v25 = vpop.eup %1277 }
 0x136   :  { %v1756_v23 = vadd.f32 %v855_v38, %v847_v21  ;;  %v1758_v24 = vadd.f32 %v866_v8, %v845_v18  ;;  %v1760_v55 = vadd.f32 %v868_v45, %v834_v16  ;;  %v734_v20 = vadd.f32 1.000001, %v733_v26  ;;  %v1113_v16 = vld [vmem:[%s1956_s3 + $0x2] ss:$0 sm:$0xff] }
 0x137   :  { %v837_v28 = vadd.f32 %v836_v22, %v799_v29  ;;  %v838_v30 = vmul.f32 %v1697_v27, %v1720_v7  ;;  %v873_v43 = vmul.f32 %v1708_v54, %v1714_v6  ;;  %v806_v53 = vsub.f32 %v1691_v52, %v805_v51 }
 0x138   :  { %v807_v32 = vmul.f32 %v1458_v46, %v804_v44  ;;  %v851_v36 = vmul.f32 %v1708_v54, %v1720_v7  ;;  %v860_v37 = vmul.f32 %v1697_v27, %v1714_v6  ;;  %1279 = vrcp.f32 %v734_v20 }
 0x139   :  { %v1773_v38 = vadd.f32 %v858_v17, %v837_v28  ;;  %v839_v8 = vmul.f32 %v1420_v34, %v838_v30  ;;  %v551_v52 = vmul.f32 %v1278_v25, %v1679_v42  ;;  %v555_v19 = vand.u32 2147483648, %v1679_v42 }
 0x13a   :  { %v808_v39 = vsub.f32 %v1694_v63, %v807_v32  ;;  %v852_v40 = vmul.f32 %v1550_v11, %v851_v36  ;;  %v874_v47 = vmul.f32 %v1550_v11, %v873_v43  ;;  %v861_v27 = vmul.f32 %v1420_v34, %v860_v37 }
 0x13b   :  { %v840_v45 = vadd.f32 %v839_v8, %v806_v53  ;;  %v829_v0 = vmul.f32 %v1708_v54, %v1717_v13  ;;  %v553_v3 = vsel %vm552_vm14, %v1679_v42, %v551_v52  ;;  %v822_v63 = vmul.f32 %v1711_v62, %v1717_v13 }
 0x13c   :  { %v853_v2 = vsub.f32 %v808_v39, %v852_v40  ;;  %v848_v5 = vmul.f32 %v1711_v62, %v1720_v7  ;;  %v556_v21 = vsel %vm554_vm15, %v555_v19, %v553_v3  ;;  %v870_v13 = vmul.f32 %v1711_v62, %v1714_v6 }
 0x13d   :  { %v1795_v18 = vadd.f32 %v874_v47, %v840_v45  ;;  %v830_v54 = vmul.f32 %v1550_v11, %v829_v0  ;;  %v1112_v26 = vadd.f32 -1.0, %v556_v21  ;;  %v823_v42 = vmul.f32 %v1560_v14, %v822_v63 }
 0x13e   :  { %v1798_v44 = vadd.f32 %v861_v27, %v853_v2  ;;  %v841_v7 = vmul.f32 %v1458_v46, %v838_v30  ;;  %v849_v51 = vmul.f32 %v1545_v10, %v848_v5  ;;  %v863_v20 = vmul.f32 %v1425_v35, %v860_v37 }
 0x13f   :  { %v831_v29 = vadd.f32 %v830_v54, %v1701_v31  ;;  %v563_v22 = vmul.f32 %v1113_v16, %v1112_v26  ;;  %v824_v17 = vadd.f32 %v823_v42, %v1723_v12  ;;  %v871_v53 = vmul.f32 %v1540_v9, %v870_v13 }
 0x140   :  { %v976_v6 = vrot.slane %v1637_v58, %v1624_v48  ;;  %v987_v12 = vrot.slane %v1637_v58, %v795_v15  ;;  %v998_v30 = vrot.slane %v1649_v61, %v1624_v48  ;;  %v885_v37 = vsub.s32 6, %v1621_v41 }
 0x141   :  { %v842_v25 = vsub.f32 %v831_v29, %v841_v7  ;;  %v564_v28 = vadd.f32 1.000001, %v563_v22  ;;  %v850_v43 = vsub.f32 %v824_v17, %v849_v51  ;;  %v918_v39 = vrot.slane %v1649_v61, %v1644_v60 }
 0x142   :  { %v969_v52 = vrot.slane %v1632_v56, %v1641_v59  ;;  %v902_v15 = vrot.slane %v1637_v58, %v1666_v1  ;;  %v879_v48 = vrot.slane %v1632_v56, %v1666_v1  ;;  %v886_v41 = vrot.slane %v1632_v56, %v885_v37 }
 0x143   :  { %v864_v32 = vadd.f32 %v863_v20, %v842_v25  ;;  %1281 = vrcp.f32 %v564_v28  ;;  %v1809_v36 = vadd.f32 %v871_v53, %v850_v43  ;;  %v909_v47 = vrot.slane %v1637_v58, %v885_v37 }
 0x144   :  { %v1843_v27 = vrot.slane %v1637_v58, %v1644_v60 }
 0x145   :  { %v1280_v62 = vpop.eup %1279 }
 0x146   :  { %v1812_v31 = vmul.f32 %v1280_v62, %v1590_v50 }
 0x148   :  { %v977_v8 = vmul.f32 %v976_v6, %v1812_v31  ;;  %v988_v50 = vmul.f32 %v987_v12, %v1812_v31  ;;  %v999_v40 = vmul.f32 %v998_v30, %v1812_v31 }
 0x14a   :  { %v1835_v45 = vmul.f32 %v1420_v34, %v977_v8  ;;  %v1838_v61 = vmul.f32 %v1425_v35, %v977_v8  ;;  %v1846_v0 = vmul.f32 %v1458_v46, %v977_v8  ;;  %v1858_v63 = vmul.f32 %v1540_v9, %v988_v50 }
 0x14b   :  { %v1861_v5 = vmul.f32 %v1545_v10, %v988_v50  ;;  %v1864_v58 = vmul.f32 %v1560_v14, %v988_v50  ;;  %v1000_v60 = vmul.f32 %v1550_v11, %v999_v40 }
 0x150   :  { %v1282_v19 = vpop.eup %1281 }
 0x151   :  { %v1849_v1 = vmul.f32 %v1282_v19, %v1588_v49  ;;  %v1852_v2 = vmul.f32 %v1282_v19, %v1598_v57  ;;  %v1855_v3 = vmul.f32 %v1282_v19, %v1606_v4 }
 0x153   :  { %v903_v49 = vmul.f32 %v902_v15, %v1849_v1  ;;  %v933_v16 = vmul.f32 %v902_v15, %v1852_v2  ;;  %v955_v57 = vmul.f32 %v902_v15, %v1855_v3  ;;  %v963_v4 = vmul.f32 %v918_v39, %v1855_v3 }
 0x154   :  { %v880_v21 = vmul.f32 %v879_v48, %v1849_v1  ;;  %v887_v54 = vmul.f32 %v886_v41, %v1849_v1  ;;  %v910_v26 = vmul.f32 %v909_v47, %v1849_v1  ;;  %v919_v42 = vmul.f32 %v918_v39, %v1849_v1 }
 0x155   :  { %v904_v13 = vmul.f32 %v1540_v9, %v903_v49  ;;  %v934_v29 = vmul.f32 %v1545_v10, %v933_v16  ;;  %v956_v7 = vmul.f32 %v1560_v14, %v955_v57  ;;  %v964_v22 = vmul.f32 %v1550_v11, %v963_v4 }
 0x156   :  { %v881_v17 = vmul.f32 %v880_v21, %v1415_v33  ;;  %v888_v51 = vmul.f32 %v1420_v34, %v887_v54  ;;  %v890_v25 = vmul.f32 %v1425_v35, %v887_v54  ;;  %v911_v20 = vmul.f32 %v1545_v10, %v910_v26 }
 0x157   :  { %v905_v28 = vsub.f32 %v1773_v38, %v904_v13  ;;  %v913_v43 = vmul.f32 %v1560_v14, %v910_v26  ;;  %v920_v53 = vmul.f32 %v1550_v11, %v919_v42  ;;  %v922_v62 = vmul.f32 %v879_v48, %v1852_v2 }
 0x158   :  { %v882_v6 = vadd.f32 %v881_v17, %v1795_v18  ;;  %v889_v12 = vadd.f32 %v888_v51, %v1760_v55  ;;  %v891_v30 = vsub.f32 %v1758_v24, %v890_v25  ;;  %v912_v37 = vadd.f32 %v911_v20, %v864_v32 }
 0x159   :  { %v935_v8 = vsub.f32 %v905_v28, %v934_v29  ;;  %v914_v50 = vsub.f32 %v1798_v44, %v913_v43  ;;  %v921_v40 = vsub.f32 %v1756_v23, %v920_v53  ;;  %v923_v38 = vmul.f32 %v922_v62, %v1415_v33 }
 0x15a   :  { %v925_v15 = vmul.f32 %v886_v41, %v1852_v2  ;;  %v936_v19 = vmul.f32 %v909_v47, %v1852_v2  ;;  %v941_v49 = vmul.f32 %v918_v39, %v1852_v2  ;;  %v944_v18 = vmul.f32 %v879_v48, %v1855_v3 }
 0x15b   :  { %v957_v16 = vsub.f32 %v935_v8, %v956_v7  ;;  %v924_v55 = vadd.f32 %v923_v38, %v914_v50  ;;  %v947_v24 = vmul.f32 %v886_v41, %v1855_v3  ;;  %v958_v32 = vmul.f32 %v909_v47, %v1855_v3 }
 0x15c   :  { %v926_v44 = vmul.f32 %v1420_v34, %v925_v15  ;;  %v928_v23 = vmul.f32 %v1458_v46, %v925_v15  ;;  %v937_v57 = vmul.f32 %v1540_v9, %v936_v19  ;;  %v939_v4 = vmul.f32 %v1560_v14, %v936_v19 }
 0x15d   :  { %v1001_v21 = vsub.f32 %v957_v16, %v1000_v60  ;;  %v942_v54 = vmul.f32 %v1550_v11, %v941_v49  ;;  %v945_v39 = vmul.f32 %v944_v18, %v1415_v33  ;;  %v948_v48 = vmul.f32 %v1425_v35, %v947_v24 }
 0x15e   :  { %v927_v26 = vadd.f32 %v926_v44, %v921_v40  ;;  %v929_v42 = vsub.f32 %v891_v30, %v928_v23  ;;  %v938_v41 = vsub.f32 %v912_v37, %v937_v57  ;;  %v940_v13 = vadd.f32 %v939_v4, %v882_v6 }
 0x15f   :  { %1002 = vst [vmem:[%s1959_s5] sm:$0xff] %v1001_v21  ;;  %v943_v47 = vadd.f32 %v942_v54, %v889_v12  ;;  %v950_v29 = vmul.f32 %v1458_v46, %v947_v24  ;;  %v959_v14 = vmul.f32 %v1540_v9, %v958_v32  ;;  %v961_v60 = vmul.f32 %v1545_v10, %v958_v32 }
 0x160   :  { %v946_v11 = vadd.f32 %v945_v39, %v938_v41  ;;  %v949_v7 = vadd.f32 %v948_v48, %v927_v26  ;;  %v965_v17 = vsub.f32 %v929_v42, %v964_v22  ;;  %v896_v51 = vmul.f32 %v1843_v27, %v1849_v1 }
 0x161   :  { %v951_v25 = vsub.f32 %v943_v47, %v950_v29  ;;  %v960_v20 = vadd.f32 %v959_v14, %v924_v55  ;;  %v962_v28 = vsub.f32 %v940_v13, %v961_v60  ;;  %v930_v43 = vmul.f32 %v1843_v27, %v1852_v2 }
 0x162   :  { %v979_v53 = vadd.f32 %v1835_v45, %v946_v11  ;;  %v990_v62 = vsub.f32 %v949_v7, %v1858_v63  ;;  %v994_v9 = vsub.f32 %v965_v17, %v1864_v58  ;;  %v897_v10 = vmul.f32 %v1458_v46, %v896_v51 }
 0x163   :  { %v981_v6 = vsub.f32 %v960_v20, %v1838_v61  ;;  %v983_v22 = vadd.f32 %v1846_v0, %v962_v28  ;;  %v992_v1 = vadd.f32 %v1861_v5, %v951_v25  ;;  %v970_v12 = vmul.f32 %v969_v52, %v1812_v31 }
 0x164   :  { %1155 = vst [vmem:[%s1959_s5 + $0x8] sm:$0xff] %v994_v9  ;;  %1157 = vst [vmem:[%s1959_s5 + $0x18] sm:$0xff] %v990_v62  ;;  %v898_v46 = vadd.f32 %v897_v10, %v1809_v36  ;;  %v931_v45 = vmul.f32 %v1425_v35, %v930_v43  ;;  %v952_v56 = vmul.f32 %v1843_v27, %v1855_v3 }
 0x165   :  { %1160 = vst [vmem:[%s1959_s5 + $0x30] sm:$0xff] %v979_v53  ;;  %1156 = vst [vmem:[%s1959_s5 + $0x10] sm:$0xff] %v992_v1  ;;  %v971_v35 = vmul.f32 %v970_v12, %v1415_v33 }
 0x166   :  { %1158 = vst [vmem:[%s1959_s5 + $0x20] sm:$0xff] %v983_v22  ;;  %1159 = vst [vmem:[%s1959_s5 + $0x28] sm:$0xff] %v981_v6  ;;  %v932_v59 = vsub.f32 %v898_v46, %v931_v45  ;;  %v953_v36 = vmul.f32 %v1420_v34, %v952_v56 }
 0x168   :  { %v954_v31 = vadd.f32 %v953_v36, %v932_v59 }
 0x16a   :  { %v972_v52 = vadd.f32 %v971_v35, %v954_v31 }
 0x16c   :  { %1161 = vst [vmem:[%s1959_s5 + $0x38] sm:$0xff] %v972_v52 }

</bundles_post_ra>
